<compile_context>
chip_gen: v6e
topology: v6e:2x2x1
jax: 0.10.0
libtpu: 0.0.40
codegen_flags: <defaults>
</compile_context>

<pallas_src>
import jax
import jax.numpy as jnp
from jax import lax
from jax.experimental import pallas as pl
from jax.experimental.pallas import tpu as pltpu


def _round_up(x, m):
    return ((x + m - 1) // m) * m


def _make_target_loss_kernel(tm, tn, npad, n_valid, compute_dtype):
    """Row x column tiled kernel with static tile/padding sizes baked in."""
    num_pad_cols = float(npad - n_valid)   # pad columns contribute exp(0)=1 to sum_all

    def kernel(params_ref, lt_col_ref, lt_row_ref, anchor_ref, contrast_ref,
               out_ref, a_ref, sum_all_ref, sum_lab_ref, sum_both_ref):
        i = pl.program_id(0)               # anchor-row tile
        k = pl.program_id(1)               # contrast-column tile (reduction axis)
        nk = pl.num_programs(1)

        alpha = params_ref[0]              # sigmoid(alpha)
        beta = params_ref[1]               # 1 + sigmoid(beta)
        inv_temp = params_ref[2]           # 1 / temperature

        @pl.when(k == 0)
        def _init():
            sum_all_ref[...] = jnp.zeros_like(sum_all_ref)
            sum_lab_ref[...] = jnp.zeros_like(sum_lab_ref)
            sum_both_ref[...] = jnp.zeros_like(sum_both_ref)
            # Fold 1/temperature into the anchor tile once per row tile.
            a_ref[...] = (anchor_ref[...].astype(jnp.float32)
                          * inv_temp).astype(compute_dtype)

        # MXU: (TM, Dp) @ (TN, Dp)^T with f32 accumulation.
        logits = lax.dot_general(
            a_ref[...], contrast_ref[...],
            (((1,), (1,)), ((), ())),
            preferred_element_type=jnp.float32)
        sim = jnp.exp(logits)                                   # (TM, TN) f32

        # Zero the global diagonal (self-similarity).  Cheap broadcasted form:
        # global row = i*TM + r, global col = k*TN + c; diag iff c == r + offset.
        rr = lax.broadcasted_iota(jnp.int32, (tm, 1), 0) + (i * tm - k * tn)
        cc = lax.broadcasted_iota(jnp.int32, (1, tn), 1)
        sim = jnp.where(cc != rr, sim, 0.0)

        lab_col = lt_col_ref[:, 0:1]                            # (TM, 1) anchor labels
        tgt_col = lt_col_ref[:, 1:2]
        lab_row = lt_row_ref[0:1, :]                            # (1, TN) contrast labels
        tgt_row = lt_row_ref[1:2, :]

        # Pad columns carry NaN labels/targets -> never match -> excluded here.
        sim_lab = jnp.where(lab_col == lab_row, sim, 0.0)
        sim_both = jnp.where(tgt_col == tgt_row, sim_lab, 0.0)

        sum_all_ref[...] += jnp.sum(sim, axis=1, keepdims=True)
        sum_lab_ref[...] += jnp.sum(sim_lab, axis=1, keepdims=True)
        sum_both_ref[...] += jnp.sum(sim_both, axis=1, keepdims=True)

        @pl.when(k == nk - 1)
        def _finalize():
            s_lab = sum_lab_ref[...]
            #   pos = beta*sum(sim*ml) + (alpha-beta)*sum(sim*ml*mt)
            #   neg = sum(sim) - sum(sim*ml)   (pad columns removed exactly)
            pos = beta * s_lab + (alpha - beta) * sum_both_ref[...]
            neg = (sum_all_ref[...] - num_pad_cols) - s_lab
            # log(pos / (pos + neg)) without a vector divide (EUP logs).
            val = jnp.log(pos) - jnp.log(pos + neg)             # (TM, 1)
            out_ref[...] = jnp.broadcast_to(val, out_ref.shape)  # lane-dense store

    return kernel


class TargetLossPallas:
    """Pallas/TPU port of JointCL `Target_loss` (contrast_mode='all', n_views=1)."""

    def __init__(self, temperature=0.07, contrast_mode='all',
                 base_temperature=0.07, alpha=0.8, beta=1.2,
                 mxu_dtype=jnp.bfloat16):
        assert contrast_mode == 'all'
        self.temperature = float(temperature)
        self.base_temperature = float(base_temperature)
        # nn.Parameter([alpha]) / nn.Parameter([beta]) — deterministic init values.
        self.alpha = jnp.float32(alpha)
        self.beta = jnp.float32(beta)
        self.mxu_dtype = mxu_dtype

    def __call__(self, features, labels, target):
        B, V, D = features.shape
        assert labels.shape[0] == B and target.shape[0] == B, \
            'Num of labels does not match num of features'
        assert V == 1, 'PyTorch reference only supports n_views == 1 (see note above)'

        N = V * B
        # torch.cat(torch.unbind(features, dim=1), dim=0)
        contrast = jnp.transpose(features, (1, 0, 2)).reshape(N, D).astype(jnp.float32)

        # --- tiling / padding policy ----------------------------------------
        Dp = _round_up(D, 128)
        Npad = 128 if N <= 128 else _round_up(N, 256)
        # Row tile: 256 fills the 256x256 MXU; 128 for small/medium N so the grid
        # still has >= 2 row tiles to shard across v7x's two TensorCores.
        TM = 256 if (Npad % 256 == 0 and Npad >= 512) else 128
        # Column (reduction) tile: ~512, must divide Npad and be a lane multiple.
        if Npad <= 512:
            TN = Npad
        elif Npad % 512 == 0:
            TN = 512
        else:
            TN = 256                                             # Npad is a 256-multiple

        mxu_dtype = self.mxu_dtype
        itemsize = jnp.dtype(mxu_dtype).itemsize

        # Padded contrast features; anchor == contrast (contrast_mode='all'), pass twice.
        contrast_p = (jnp.zeros((Npad, Dp), jnp.float32)
                      .at[:N, :D].set(contrast)).astype(mxu_dtype)

        # Labels/targets packed as rows (for the column tile) and columns (row tile).
        # NaN sentinels on pad entries never equal any real class id.
        lab = labels.astype(jnp.float32).reshape(N)
        tgt = target.astype(jnp.float32).reshape(N)
        lt_row = (jnp.full((2, Npad), jnp.nan, jnp.float32)
                  .at[0, :N].set(lab).at[1, :N].set(tgt))        # (2, Npad)
        lt_col = lt_row.T                                        # (Npad, 2)

        params = jnp.stack([
            jax.nn.sigmoid(self.alpha),
            1.0 + jax.nn.sigmoid(self.beta),
            jnp.float32(1.0 / self.temperature),
        ]).astype(jnp.float32)

        kernel = _make_target_loss_kernel(TM, TN, Npad, N, mxu_dtype)

        # --- VMEM limit: actual need + headroom, capped at 80% of physical ----
        try:
            vmem_cap = int(pltpu.get_tpu_info().vmem_capacity_bytes)
        except Exception:
            vmem_cap = 64 * 1024 * 1024
        vmem_need = (
            2 * (TM * Dp + TN * Dp) * itemsize                    # anchor/contrast (x2 bufs)
            + 2 * (TM * 128 * 4 + 8 * TN * 4 + TM * 128 * 4)      # lt_col, lt_row, out blocks
            + TM * Dp * itemsize + 3 * TM * 128 * 4               # scratch
            + 8 * TM * TN * 4)                                    # live (TM, TN) temporaries
        vmem_limit = int(min(max(vmem_need + (4 << 20), 16 << 20),
                             int(0.8 * vmem_cap)))

        cost = pl.CostEstimate(
            flops=2 * Npad * Npad * Dp,
            transcendentals=Npad * Npad,
            bytes_accessed=int((Npad // TM) * Npad * Dp * itemsize   # contrast re-streamed
                               + Npad * Dp * itemsize                # anchor
                               + Npad * 128 * 4 + 4 * Npad * 4))

        grid_spec = pltpu.PrefetchScalarGridSpec(
            num_scalar_prefetch=1,                               # params -> SMEM
            grid=(Npad // TM, Npad // TN),
            in_specs=[
                pl.BlockSpec((TM, 2), lambda i, k, p: (i, 0)),   # anchor labels/targets
                pl.BlockSpec((2, TN), lambda i, k, p: (0, k)),   # contrast labels/targets
                pl.BlockSpec((TM, Dp), lambda i, k, p: (i, 0)),  # anchor row tile
                pl.BlockSpec((TN, Dp), lambda i, k, p: (k, 0)),  # contrast column tile
            ],
            out_specs=pl.BlockSpec((TM, 128), lambda i, k, p: (i, 0)),
            scratch_shapes=[
                pltpu.VMEM((TM, Dp), mxu_dtype),                 # inv_temp-scaled anchor
                pltpu.VMEM((TM, 1), jnp.float32),                # sum_all
                pltpu.VMEM((TM, 1), jnp.float32),                # sum_lab
                pltpu.VMEM((TM, 1), jnp.float32),                # sum_both
            ],
        )

        out = pl.pallas_call(
            kernel,
            out_shape=jax.ShapeDtypeStruct((Npad, 128), jnp.float32),
            grid_spec=grid_spec,
            compiler_params=pltpu.CompilerParams(
                dimension_semantics=("parallel", "arbitrary"),
                vmem_limit_bytes=vmem_limit),
            cost_estimate=cost,
        )(params, lt_col, lt_row, contrast_p, contrast_p)

        per_row = out[:N, 0]                                     # log(pos / (pos + neg))
        loss = -jnp.mean(per_row)
        # Same guard as the PyTorch module: overflow / zero-positive rows -> 0.
        return jnp.where(jnp.isnan(loss) | jnp.isinf(loss), jnp.float32(0.0), loss)


def target_loss_ref(features, labels, target, alpha_p, beta_p, temperature=0.07):
    """Pure-JAX mirror of the PyTorch forward (n_views == 1)."""
    B, V, D = features.shape
    labels = labels.reshape(-1, 1)
    target = target.reshape(-1, 1)
    mask_labels = (labels == labels.T).astype(jnp.float32)
    mask_target = (target == target.T).astype(jnp.float32)
    alpha = jax.nn.sigmoid(alpha_p)
    beta = 1.0 + jax.nn.sigmoid(beta_p)
    m = mask_labels * mask_target
    mask = (mask_labels - m) * beta + m * alpha
    contrast = jnp.concatenate([features[:, v] for v in range(V)], axis=0)
    anchor = contrast
    N = V * B
    mask = jnp.tile(mask, (V, V))
    logits_mask = 1.0 - jnp.eye(N, dtype=jnp.float32)
    mask_pos = mask * logits_mask
    mask_neg = (1.0 - mask_labels) * logits_mask
    sim = jnp.exp(jnp.dot(anchor, contrast.T,
                          precision=lax.Precision.HIGHEST) / temperature)
    pos = jnp.sum(sim * mask_pos, axis=1)
    neg = jnp.sum(sim * mask_neg, axis=1)
    loss = -jnp.mean(jnp.log(pos / (pos + neg)))
    return jnp.where(jnp.isnan(loss) | jnp.isinf(loss), jnp.float32(0.0), loss)


if __name__ == "__main__":
    def make_feats(key, b, d):
        f = jax.random.normal(key, (b, 1, d), dtype=jnp.float32)
        # SupCon-style L2-normalized features (keeps exp(logits/0.07) finite).
        return f / jnp.linalg.norm(f, axis=-1, keepdims=True)

    a0, b0 = jnp.float32(0.8), jnp.float32(1.2)

    # Case 1: tiny batch, default bf16 MXU path.
    B, D = 8, 32
    feats = make_feats(jax.random.PRNGKey(0), B, D)
    labels = jnp.array([0, 0, 1, 1, 2, 2, 0, 1], dtype=jnp.int32)
    target = jnp.array([0, 1, 0, 1, 0, 1, 0, 1], dtype=jnp.int32)
    mod = TargetLossPallas()
    loss = jax.block_until_ready(mod(feats, labels, target))
    ref = target_loss_ref(feats, labels, target, a0, b0, 0.07)
    assert jnp.isfinite(loss), loss
    assert jnp.allclose(loss, ref, rtol=5e-2, atol=1e-2), (loss, ref)

    # Case 2: N not a multiple of 8 -> exercises the pad-column handling.
    B2 = 10
    feats2 = make_feats(jax.random.PRNGKey(1), B2, D)
    labels2 = jnp.array([0, 0, 1, 1, 2, 2, 0, 1, 2, 0], dtype=jnp.int32)
    target2 = jnp.array([0, 1, 0, 1, 0, 1, 0, 1, 0, 1], dtype=jnp.int32)
    loss2 = jax.block_until_ready(mod(feats2, labels2, target2))
    ref2 = target_loss_ref(feats2, labels2, target2, a0, b0, 0.07)
    assert jnp.allclose(loss2, ref2, rtol=5e-2, atol=1e-2), (loss2, ref2)

    # Case 3: multi row/column tile grid (streaming + accumulators + diag mask
    # across tiles), f32 MXU path for a tight check of the kernel algebra.
    B3, D3 = 600, 64
    feats3 = make_feats(jax.random.PRNGKey(2), B3, D3)
    labels3 = jax.random.randint(jax.random.PRNGKey(3), (B3,), 0, 5, dtype=jnp.int32)
    target3 = jax.random.randint(jax.random.PRNGKey(4), (B3,), 0, 2, dtype=jnp.int32)
    mod_f32 = TargetLossPallas(mxu_dtype=jnp.float32)
    loss3 = jax.block_until_ready(mod_f32(feats3, labels3, target3))
    ref3 = target_loss_ref(feats3, labels3, target3, a0, b0, 0.07)
    assert jnp.allclose(loss3, ref3, rtol=1e-3, atol=1e-4), (loss3, ref3)

    # Case 3b: same shapes on the default bf16 perf path (loose tolerance).
    loss3b = jax.block_until_ready(mod(feats3, labels3, target3))
    assert jnp.isfinite(loss3b), loss3b
    assert jnp.allclose(loss3b, ref3, rtol=1.5e-1, atol=2e-2), (loss3b, ref3)

    print("KERNEL_OK")
</pallas_src>

<mosaic_0001>
module attributes {stable_mosaic.version = 11 : i64} {
  func.func @kernel(%arg0: i32, %arg1: i32, %arg2: memref<3xf32, #tpu.memory_space<smem>>, %arg3: memref<128x2xf32, #tpu.memory_space<vmem>>, %arg4: memref<2x128xf32, #tpu.memory_space<vmem>>, %arg5: memref<128x128xbf16, #tpu.memory_space<vmem>>, %arg6: memref<128x128xbf16, #tpu.memory_space<vmem>>, %arg7: memref<128x128xf32, #tpu.memory_space<vmem>>, %arg8: memref<128x128xbf16, #tpu.memory_space<vmem>>, %arg9: memref<128x1xf32, #tpu.memory_space<vmem>>, %arg10: memref<128x1xf32, #tpu.memory_space<vmem>>, %arg11: memref<128x1xf32, #tpu.memory_space<vmem>>) attributes {dimension_semantics = [#tpu.dimension_semantics<parallel>, #tpu.dimension_semantics<arbitrary>], iteration_bounds = array<i64: 1, 1>, scalar_prefetch = 1 : i64, scratch_operands = 4 : i64, tpu.core_type = #tpu.core_type<tc>, window_params = [{transform_indices = @transform_0, window_bounds = array<i64: 128, 2>}, {transform_indices = @transform_1, window_bounds = array<i64: 2, 128>}, {transform_indices = @transform_2, window_bounds = array<i64: 128, 128>}, {transform_indices = @transform_3, window_bounds = array<i64: 128, 128>}, {transform_indices = @transform_4, window_bounds = array<i64: 128, 128>}]} {
    %c0 = arith.constant 0 : index
    %0 = memref.load %arg2[%c0] : memref<3xf32, #tpu.memory_space<smem>>
    %c1 = arith.constant 1 : index
    %1 = memref.load %arg2[%c1] : memref<3xf32, #tpu.memory_space<smem>>
    %c2 = arith.constant 2 : index
    %2 = memref.load %arg2[%c2] : memref<3xf32, #tpu.memory_space<smem>>
    %c0_i32 = arith.constant 0 : i32
    %3 = arith.cmpi eq, %arg1, %c0_i32 : i32
    %4 = arith.extui %3 : i1 to i32
    %c0_i32_0 = arith.constant 0 : i32
    %5 = arith.cmpi ne, %4, %c0_i32_0 : i32
    scf.if %5 {
      %cst_34 = arith.constant 0.000000e+00 : f32
      %54 = vector.broadcast %cst_34 : f32 to vector<128x1xf32>
      %c0_35 = arith.constant 0 : index
      %c0_36 = arith.constant 0 : index
      %55 = vector.load %arg9[%c0_35, %c0_36] : memref<128x1xf32, #tpu.memory_space<vmem>>, vector<128x1xf32>
      tpu.vector_store %arg9[%c0_35, %c0_36], %54 {strides = array<i32>} : memref<128x1xf32, #tpu.memory_space<vmem>>, vector<128x1xf32>,
      %cst_37 = arith.constant 0.000000e+00 : f32
      %56 = vector.broadcast %cst_37 : f32 to vector<128x1xf32>
      %c0_38 = arith.constant 0 : index
      %c0_39 = arith.constant 0 : index
      %57 = vector.load %arg10[%c0_38, %c0_39] : memref<128x1xf32, #tpu.memory_space<vmem>>, vector<128x1xf32>
      tpu.vector_store %arg10[%c0_38, %c0_39], %56 {strides = array<i32>} : memref<128x1xf32, #tpu.memory_space<vmem>>, vector<128x1xf32>,
      %cst_40 = arith.constant 0.000000e+00 : f32
      %58 = vector.broadcast %cst_40 : f32 to vector<128x1xf32>
      %c0_41 = arith.constant 0 : index
      %c0_42 = arith.constant 0 : index
      %59 = vector.load %arg11[%c0_41, %c0_42] : memref<128x1xf32, #tpu.memory_space<vmem>>, vector<128x1xf32>
      tpu.vector_store %arg11[%c0_41, %c0_42], %58 {strides = array<i32>} : memref<128x1xf32, #tpu.memory_space<vmem>>, vector<128x1xf32>,
      %c0_43 = arith.constant 0 : index
      %c0_44 = arith.constant 0 : index
      %60 = vector.load %arg5[%c0_43, %c0_44] : memref<128x128xbf16, #tpu.memory_space<vmem>>, vector<128x128xbf16>
      %61 = arith.extf %60 : vector<128x128xbf16> to vector<128x128xf32>
      %62 = vector.broadcast %2 : f32 to vector<128x128xf32>
      %63 = arith.mulf %61, %62 : vector<128x128xf32>
      %64 = arith.truncf %63 : vector<128x128xf32> to vector<128x128xbf16>
      %c0_45 = arith.constant 0 : index
      %c0_46 = arith.constant 0 : index
      %65 = vector.load %arg8[%c0_45, %c0_46] : memref<128x128xbf16, #tpu.memory_space<vmem>>, vector<128x128xbf16>
      tpu.vector_store %arg8[%c0_45, %c0_46], %64 {strides = array<i32>} : memref<128x128xbf16, #tpu.memory_space<vmem>>, vector<128x128xbf16>,
    } else {
    }
    %c0_1 = arith.constant 0 : index
    %c0_2 = arith.constant 0 : index
    %6 = vector.load %arg8[%c0_1, %c0_2] : memref<128x128xbf16, #tpu.memory_space<vmem>>, vector<128x128xbf16>
    %c0_3 = arith.constant 0 : index
    %c0_4 = arith.constant 0 : index
    %7 = vector.load %arg6[%c0_3, %c0_4] : memref<128x128xbf16, #tpu.memory_space<vmem>>, vector<128x128xbf16>
    %cst = arith.constant dense<0.000000e+00> : vector<128x128xf32>
    %8 = tpu.matmul %6, %7, %cst {dimension_numbers = #tpu.dot_dimension_numbers<[1], [1], [0], [0], [0, 0, 1, 0], [], []>} : vector<128x128xbf16>, vector<128x128xbf16>, vector<128x128xf32> -> vector<128x128xf32>
    %9 = math.exp %8 : vector<128x128xf32>
    %10 = tpu.iota {dimensions = array<i32: 0>} : vector<128x1xi32>
    %c128_i32 = arith.constant 128 : i32
    %11 = arith.muli %arg0, %c128_i32 : i32
    %c128_i32_5 = arith.constant 128 : i32
    %12 = arith.muli %arg1, %c128_i32_5 : i32
    %13 = arith.subi %11, %12 : i32
    %14 = vector.broadcast %13 : i32 to vector<128x1xi32>
    %15 = arith.addi %10, %14 : vector<128x1xi32>
    %16 = tpu.iota {dimensions = array<i32: 1>} : vector<1x128xi32>
    %17 = vector.broadcast %16 : vector<1x128xi32> to vector<128x128xi32>
    %18 = vector.broadcast %15 : vector<128x1xi32> to vector<128x128xi32>
    %19 = arith.cmpi ne, %17, %18 : vector<128x128xi32>
    %cst_6 = arith.constant 0.000000e+00 : f32
    %20 = vector.broadcast %cst_6 : f32 to vector<128x128xf32>
    %21 = arith.select %19, %9, %20 : vector<128x128xi1>, vector<128x128xf32>
    %c0_7 = arith.constant 0 : index
    %c0_8 = arith.constant 0 : index
    %22 = vector.load %arg3[%c0_7, %c0_8] : memref<128x2xf32, #tpu.memory_space<vmem>>, vector<128x1xf32>
    %c0_9 = arith.constant 0 : index
    %c1_10 = arith.constant 1 : index
    %23 = vector.load %arg3[%c0_9, %c1_10] : memref<128x2xf32, #tpu.memory_space<vmem>>, vector<128x1xf32>
    %c0_11 = arith.constant 0 : index
    %c0_12 = arith.constant 0 : index
    %24 = vector.load %arg4[%c0_11, %c0_12] : memref<2x128xf32, #tpu.memory_space<vmem>>, vector<1x128xf32>
    %c1_13 = arith.constant 1 : index
    %c0_14 = arith.constant 0 : index
    %25 = vector.load %arg4[%c1_13, %c0_14] : memref<2x128xf32, #tpu.memory_space<vmem>>, vector<1x128xf32>
    %26 = vector.broadcast %22 : vector<128x1xf32> to vector<128x128xf32>
    %27 = vector.broadcast %24 : vector<1x128xf32> to vector<128x128xf32>
    %28 = arith.cmpf oeq, %26, %27 : vector<128x128xf32>
    %cst_15 = arith.constant 0.000000e+00 : f32
    %29 = vector.broadcast %cst_15 : f32 to vector<128x128xf32>
    %30 = arith.select %28, %21, %29 : vector<128x128xi1>, vector<128x128xf32>
    %31 = vector.broadcast %23 : vector<128x1xf32> to vector<128x128xf32>
    %32 = vector.broadcast %25 : vector<1x128xf32> to vector<128x128xf32>
    %33 = arith.cmpf oeq, %31, %32 : vector<128x128xf32>
    %cst_16 = arith.constant 0.000000e+00 : f32
    %34 = vector.broadcast %cst_16 : f32 to vector<128x128xf32>
    %35 = arith.select %33, %30, %34 : vector<128x128xi1>, vector<128x128xf32>
    %c0_17 = arith.constant 0 : index
    %c0_18 = arith.constant 0 : index
    %36 = vector.load %arg9[%c0_17, %c0_18] : memref<128x1xf32, #tpu.memory_space<vmem>>, vector<128x1xf32>
    %cst_19 = arith.constant dense<0.000000e+00> : vector<128xf32>
    %37 = vector.multi_reduction <add>, %21, %cst_19 [1] : vector<128x128xf32> to vector<128xf32>
    %38 = vector.shape_cast %37 : vector<128xf32> to vector<128x1xf32>
    %39 = arith.addf %36, %38 : vector<128x1xf32>
    %c0_20 = arith.constant 0 : index
    %c0_21 = arith.constant 0 : index
    %40 = vector.load %arg9[%c0_20, %c0_21] : memref<128x1xf32, #tpu.memory_space<vmem>>, vector<128x1xf32>
    tpu.vector_store %arg9[%c0_20, %c0_21], %39 {strides = array<i32>} : memref<128x1xf32, #tpu.memory_space<vmem>>, vector<128x1xf32>,
    %c0_22 = arith.constant 0 : index
    %c0_23 = arith.constant 0 : index
    %41 = vector.load %arg10[%c0_22, %c0_23] : memref<128x1xf32, #tpu.memory_space<vmem>>, vector<128x1xf32>
    %cst_24 = arith.constant dense<0.000000e+00> : vector<128xf32>
    %42 = vector.multi_reduction <add>, %30, %cst_24 [1] : vector<128x128xf32> to vector<128xf32>
    %43 = vector.shape_cast %42 : vector<128xf32> to vector<128x1xf32>
    %44 = arith.addf %41, %43 : vector<128x1xf32>
    %c0_25 = arith.constant 0 : index
    %c0_26 = arith.constant 0 : index
    %45 = vector.load %arg10[%c0_25, %c0_26] : memref<128x1xf32, #tpu.memory_space<vmem>>, vector<128x1xf32>
    tpu.vector_store %arg10[%c0_25, %c0_26], %44 {strides = array<i32>} : memref<128x1xf32, #tpu.memory_space<vmem>>, vector<128x1xf32>,
    %c0_27 = arith.constant 0 : index
    %c0_28 = arith.constant 0 : index
    %46 = vector.load %arg11[%c0_27, %c0_28] : memref<128x1xf32, #tpu.memory_space<vmem>>, vector<128x1xf32>
    %cst_29 = arith.constant dense<0.000000e+00> : vector<128xf32>
    %47 = vector.multi_reduction <add>, %35, %cst_29 [1] : vector<128x128xf32> to vector<128xf32>
    %48 = vector.shape_cast %47 : vector<128xf32> to vector<128x1xf32>
    %49 = arith.addf %46, %48 : vector<128x1xf32>
    %c0_30 = arith.constant 0 : index
    %c0_31 = arith.constant 0 : index
    %50 = vector.load %arg11[%c0_30, %c0_31] : memref<128x1xf32, #tpu.memory_space<vmem>>, vector<128x1xf32>
    tpu.vector_store %arg11[%c0_30, %c0_31], %49 {strides = array<i32>} : memref<128x1xf32, #tpu.memory_space<vmem>>, vector<128x1xf32>,
    %c0_i32_32 = arith.constant 0 : i32
    %51 = arith.cmpi eq, %arg1, %c0_i32_32 : i32
    %52 = arith.extui %51 : i1 to i32
    %c0_i32_33 = arith.constant 0 : i32
    %53 = arith.cmpi ne, %52, %c0_i32_33 : i32
    scf.if %53 {
      %c0_34 = arith.constant 0 : index
      %c0_35 = arith.constant 0 : index
      %54 = vector.load %arg10[%c0_34, %c0_35] : memref<128x1xf32, #tpu.memory_space<vmem>>, vector<128x1xf32>
      %55 = vector.broadcast %1 : f32 to vector<128x1xf32>
      %56 = arith.mulf %55, %54 : vector<128x1xf32>
      %57 = arith.subf %0, %1 : f32
      %c0_36 = arith.constant 0 : index
      %c0_37 = arith.constant 0 : index
      %58 = vector.load %arg11[%c0_36, %c0_37] : memref<128x1xf32, #tpu.memory_space<vmem>>, vector<128x1xf32>
      %59 = vector.broadcast %57 : f32 to vector<128x1xf32>
      %60 = arith.mulf %59, %58 : vector<128x1xf32>
      %61 = arith.addf %56, %60 : vector<128x1xf32>
      %c0_38 = arith.constant 0 : index
      %c0_39 = arith.constant 0 : index
      %62 = vector.load %arg9[%c0_38, %c0_39] : memref<128x1xf32, #tpu.memory_space<vmem>>, vector<128x1xf32>
      %cst_40 = arith.constant 1.200000e+02 : f32
      %63 = vector.broadcast %cst_40 : f32 to vector<128x1xf32>
      %64 = arith.subf %62, %63 : vector<128x1xf32>
      %65 = arith.subf %64, %54 : vector<128x1xf32>
      %66 = math.log %61 : vector<128x1xf32>
      %67 = arith.addf %61, %65 : vector<128x1xf32>
      %68 = math.log %67 : vector<128x1xf32>
      %69 = arith.subf %66, %68 : vector<128x1xf32>
      %70 = vector.shape_cast %69 : vector<128x1xf32> to vector<128x1xf32>
      %71 = vector.broadcast %70 : vector<128x1xf32> to vector<128x128xf32>
      %c0_41 = arith.constant 0 : index
      %c0_42 = arith.constant 0 : index
      %72 = vector.load %arg7[%c0_41, %c0_42] : memref<128x128xf32, #tpu.memory_space<vmem>>, vector<128x128xf32>
      tpu.vector_store %arg7[%c0_41, %c0_42], %71 {strides = array<i32>} : memref<128x128xf32, #tpu.memory_space<vmem>>, vector<128x128xf32>,
    } else {
    }
    return
  }
  func.func @transform_0(%arg0: i32, %arg1: i32, %arg2: memref<3xf32, #tpu.memory_space<smem>>) -> (i32, i32) {
    %c0_i32 = arith.constant 0 : i32
    %c0_i32_0 = arith.constant 0 : i32
    return %arg0, %c0_i32 : i32, i32
  }
  func.func @transform_1(%arg0: i32, %arg1: i32, %arg2: memref<3xf32, #tpu.memory_space<smem>>) -> (i32, i32) {
    %c0_i32 = arith.constant 0 : i32
    %c0_i32_0 = arith.constant 0 : i32
    return %c0_i32, %arg1 : i32, i32
  }
  func.func @transform_2(%arg0: i32, %arg1: i32, %arg2: memref<3xf32, #tpu.memory_space<smem>>) -> (i32, i32) {
    %c0_i32 = arith.constant 0 : i32
    %c0_i32_0 = arith.constant 0 : i32
    return %arg0, %c0_i32 : i32, i32
  }
  func.func @transform_3(%arg0: i32, %arg1: i32, %arg2: memref<3xf32, #tpu.memory_space<smem>>) -> (i32, i32) {
    %c0_i32 = arith.constant 0 : i32
    %c0_i32_0 = arith.constant 0 : i32
    return %arg1, %c0_i32 : i32, i32
  }
  func.func @transform_4(%arg0: i32, %arg1: i32, %arg2: memref<3xf32, #tpu.memory_space<smem>>) -> (i32, i32) {
    %c0_i32 = arith.constant 0 : i32
    %c0_i32_0 = arith.constant 0 : i32
    return %arg0, %c0_i32 : i32, i32
  }
}

</mosaic_0001>

<bundles_post_ra>
// kernel: tpu_custom_call.1
= control target key start
LH: loop header
LB: loop body
LE: loop exit
PB: predicated region body
PF: predicated region fallthrough
CT: control target
= control target key end

     0   :  { %s1728_s18 = smov [#allocation7]   ;;  %s2304_s0 = inlined_call_operand.hbm [shape: f32[3], index: 0, kind: input, shape index: {}]   ;;  %s2305_s1 = inlined_call_operand.vmem [shape: f32[128,2], index: 1, kind: input, shape index: {}]   ;;  %s2306_s2 = inlined_call_operand.vmem [shape: f32[2,128], index: 2, kind: input, shape index: {}]   ;;  %s2307_s3 = inlined_call_operand.vmem [shape: bf16[128,128], index: 3, kind: input, shape index: {}]   ;;  %s2308_s4 = inlined_call_operand.vmem [shape: bf16[128,128], index: 4, kind: input, shape index: {}]   ;;  %s2309_s5 = inlined_call_operand.hbm [shape: f32[128,128], index: 5, kind: output, shape index: {}]  }
   0x1   :  { %11 = dma.hbm_to_smem %s2304_s0, 16, %s1728_s18, [#allocation6] }
   0x2   :  { %1724 = dma.done.wait [#allocation6], 16 }
   0x3   :  { %1725 = vsyncadd [#allocation6], 4294967280 }
   0x4   :  { %13 = sfence }
   0x5   :  { %v1584_v0 = vld [vmem:[%s2308_s4 + $0x38] sm:$0xff]   ;;  %v1585_v1 = vld [vmem:[%s2308_s4 + $0x30] sm:$0xff]   ;;  %v1729_v2 = vmov 1   ;;  %v1730_v3 = vmov 0   ;;  %v1586_v4 = vld [vmem:[%s2308_s4 + $0x28] sm:$0xff]   ;;  %s1355_s26 = sld [smem:[#allocation7 + $0x2]] }
   0x6   :  { %1580 = vset.pattern.permute.xlu0 %v1729_v2  ;;  %1524 = vmatprep.subr.bf16.mxu0 %v1584_v0  ;;  %v1423_v5 = vld [vmem:[%s2307_s3] sm:$0xff]   ;;  %v1494_v7 = vld [vmem:[%s2307_s3 + $0x8] sm:$0xff]   ;;  %v1495_v9 = vld [vmem:[%s2307_s3 + $0x10] sm:$0xff]  }
   0x7   :  { %1556 = vmatprep.subr.bf16.mxu1 %v1584_v0  ;;  %1525 = vmatpush3.bf16.xpose.msra.mxu0 %v1584_v0  ;;  %v1497_v6 = vld [vmem:[%s2307_s3 + $0x20] sm:$0xff]   ;;  %v1498_v8 = vld [vmem:[%s2307_s3 + $0x28] sm:$0xff]   ;;  %v1424_v10 = vunpack.c.l.bf16 %v1423_v5  ;;  %v1499_v11 = vld [vmem:[%s2307_s3 + $0x30] sm:$0xff]   ;;  %v1425_v14 = vunpack.c.h.bf16 %v1423_v5  ;;  %v1428_v17 = vunpack.c.l.bf16 %v1494_v7  ;;  %v1429_v20 = vunpack.c.h.bf16 %v1494_v7 }
   0x8   :  { %1564 = vmatpush3.bf16.xpose.msra.mxu1 %v1584_v0  ;;  %1526 = vmatprep.subr.bf16.mxu0 %v1585_v1  ;;  %v1496_v12 = vld [vmem:[%s2307_s3 + $0x18] sm:$0xff]   ;;  %v1803_v13 = vld [vmem:[%s2305_s1] sm:$0xff]  ;;  %v1440_v15 = vunpack.c.l.bf16 %v1497_v6  ;;  %v1441_v16 = vunpack.c.h.bf16 %v1497_v6  ;;  %v1811_v19 = vld [vmem:[%s2305_s1 + $0x10] sm:$0xff]  ;;  %v1444_v21 = vunpack.c.l.bf16 %v1498_v8  ;;  %v1445_v22 = vunpack.c.h.bf16 %v1498_v8 }
   0x9   :  { %1557 = vmatprep.subr.bf16.mxu1 %v1585_v1  ;;  %1579 = vset.pattern.permute.xlu1 %v1730_v3  ;;  %v1500_v18 = vld [vmem:[%s2307_s3 + $0x38] sm:$0xff]   ;;  %v1432_v23 = vunpack.c.l.bf16 %v1495_v9  ;;  %v1433_v24 = vunpack.c.h.bf16 %v1495_v9  ;;  %v1448_v25 = vunpack.c.l.bf16 %v1499_v11  ;;  %v1449_v26 = vunpack.c.h.bf16 %v1499_v11  ;;  %v1587_v37 = vld [vmem:[%s2308_s4 + $0x20] sm:$0xff]  }
   0xa   :  { %v1436_v27 = vunpack.c.l.bf16 %v1496_v12  ;;  %672 = vperm.xlu0 %1580, %v1803_v13   ;;  %567 = vperm.xlu1 %1579, %v1811_v19   ;;  %v1437_v29 = vunpack.c.h.bf16 %v1496_v12  ;;  %v1452_v30 = vunpack.c.l.bf16 %v1500_v18  ;;  %v1453_v31 = vunpack.c.h.bf16 %v1500_v18  ;;  %v540_v32 = vld [vmem:[%s2305_s1 + $0x18] sm:$0xff] }
   0xb   :  { %v112_v28 = vstv %s1355_s26 }
   0xc   :  { %v113_v33 = vmul.f32 %v1424_v10, %v112_v28  ;;  %v114_v34 = vmul.f32 %v1425_v14, %v112_v28  ;;  %v121_v35 = vmul.f32 %v1440_v15, %v112_v28  ;;  %v122_v36 = vmul.f32 %v1441_v16, %v112_v28 }
   0xd   :  { %v115_v38 = vmul.f32 %v1428_v17, %v112_v28  ;;  %v116_v39 = vmul.f32 %v1429_v20, %v112_v28  ;;  %v123_v40 = vmul.f32 %v1444_v21, %v112_v28  ;;  %v124_v41 = vmul.f32 %v1445_v22, %v112_v28 }
   0xf   :  { %1527 = vmatpush3.bf16.xpose.msra.mxu0 %v1585_v1 }
  0x10   :  { %1565 = vmatpush3.bf16.xpose.msra.mxu1 %v1585_v1  ;;  %1528 = vmatprep.subr.bf16.mxu0 %v1586_v4 }
  0x11   :  { %1558 = vmatprep.subr.bf16.mxu1 %v1586_v4 }
  0x12   :  { %14 = vsyncpa [#allocation9], 0  ;;  %v1457_v42 = vpack.c.bf16 %v114_v34, %v113_v33  ;;  %v1477_v43 = vpack.c.bf16 %v122_v36, %v121_v35  ;;  %v117_v44 = vmul.f32 %v1432_v23, %v112_v28  ;;  %v118_v45 = vmul.f32 %v1433_v24, %v112_v28  ;;  %684 = vperm.xlu0 %1580, %v540_v32   ;;  %v542_v50 = vld [vmem:[%s2305_s1 + $0x28] sm:$0xff]  ;;  %v544_v59 = vld [vmem:[%s2305_s1 + $0x38] sm:$0xff]  ;;  %s1732_s10 = smov [#allocation8]  }
  0x13   :  { %v1462_v46 = vpack.c.bf16 %v116_v39, %v115_v38  ;;  %v1482_v47 = vpack.c.bf16 %v124_v41, %v123_v40  ;;  %v125_v48 = vmul.f32 %v1448_v25, %v112_v28  ;;  %v126_v49 = vmul.f32 %v1449_v26, %v112_v28  ;;  %572 = vperm.xlu1 %1579, %v540_v32   ;;  %v1588_v60 = vld [vmem:[%s2308_s4 + $0x18] sm:$0xff]   ;;  %v546_v61 = vld [vmem:[%s2305_s1 + $0x48] sm:$0xff]  ;;  %v1589_v1 = vld [vmem:[%s2308_s4 + $0x10] sm:$0xff]   ;;  %s1343_s11 = sshll.u32 %s1732_s10, 4  ;;  %s1344_s11 = int_to_ptr.vmem [resolvable:$true] %s1343_s11 }
  0x14   :  { %1458 = vst [vmem:[#allocation2] sm:$0xff] %v1457_v42   ;;  %1504 = vst [vmem:[#allocation2 + $0x20] sm:$0xff] %v1477_v43   ;;  %v1467_v51 = vpack.c.bf16 %v118_v45, %v117_v44  ;;  %v119_v52 = vmul.f32 %v1436_v27, %v112_v28  ;;  %v120_v53 = vmul.f32 %v1437_v29, %v112_v28  ;;  %v548_v0 = vld [vmem:[%s2305_s1 + $0x58] sm:$0xff]  ;;  %v1590_v6 = vld [vmem:[%s2308_s4 + $0x8] sm:$0xff]   ;;  %v466_v29 = vlaneseq  ;;  %s1704_s12 = scalar_lea.vmem %s1344_s11, 2048  ;;  %p1709_p1 = scmp.lt.s32.totalorder %s1344_s11, %s1344_s11 }
  0x15   :  { %1501 = vst [vmem:[#allocation2 + $0x8] sm:$0xff] %v1462_v46   ;;  %1505 = vst [vmem:[#allocation2 + $0x28] sm:$0xff] %v1482_v47   ;;  %v1487_v54 = vpack.c.bf16 %v126_v49, %v125_v48  ;;  %v127_v55 = vmul.f32 %v1452_v30, %v112_v28  ;;  %v128_v56 = vmul.f32 %v1453_v31, %v112_v28  ;;  %v552_v5 = vld [vmem:[%s2305_s1 + $0x78] sm:$0xff]  ;;  %v538_v7 = vld [vmem:[%s2305_s1 + $0x8] sm:$0xff]  ;;  %vm2310_vm11 = vcmask 7168   ;;  %p1705_p0 = scmp.ne.s32.totalorder %s1344_s11, %s1704_s12  ;;  %p1710_p2 = scmp.lt.s32.totalorder %s1704_s12, %s1704_s12 }
  0x16   :  { %1502 = vst [vmem:[#allocation2 + $0x10] sm:$0xff] %v1467_v51   ;;  %v1472_v57 = vpack.c.bf16 %v120_v53, %v119_v52  ;;  %692 = vperm.xlu0 %1580, %v542_v50   ;;  %v1591_v8 = vld [vmem:[%s2308_s4] sm:$0xff]   ;;  %v547_v15 = vld [vmem:[%s2305_s1 + $0x50] sm:$0xff]  ;;  %v1911_v32 = vshrl.u32 %v466_v29, 7  ;;  %v1913_v33 = vand.u32 127, %v466_v29 }
  0x17   :  { %1529 = vmatpush3.bf16.xpose.msra.mxu0 %v1586_v4  ;;  %1506 = vst [vmem:[#allocation2 + $0x30] sm:$0xff] %v1487_v54   ;;  %v1492_v58 = vpack.c.bf16 %v128_v56, %v127_v55  ;;  %582 = vperm.xlu1 %1579, %v542_v50   ;;  %v541_v9 = vld [vmem:[%s2305_s1 + $0x20] sm:$0xff]  ;;  %v1731_v50 = vmov 0.0   ;;  %p1711_p3 = por %p1710_p2, %p1709_p1 }
  0x18   :  { %1566 = vmatpush3.bf16.xpose.msra.mxu1 %v1586_v4  ;;  %1530 = vmatprep.subr.bf16.mxu0 %v1587_v37  ;;  %1503 = vst [vmem:[#allocation2 + $0x18] sm:$0xff] %v1472_v57   ;;  %v550_v4 = vld [vmem:[%s2305_s1 + $0x68] sm:$0xff]  ;;  %v545_v12 = vld [vmem:[%s2305_s1 + $0x40] sm:$0xff]  ;;  %v1916_v34 = vadd.s32 32, %v1911_v32  ;;  %v1919_v35 = vadd.s32 96, %v1911_v32  ;;  %v1930_v38 = vadd.s32 40, %v1911_v32  ;;  %vm505_vm13 = vcmp.ne.s32.totalorder %v1913_v33, %v1911_v32 }
  0x19   :  { %1559 = vmatprep.subr.bf16.mxu1 %v1587_v37  ;;  %1507 = vst [vmem:[#allocation2 + $0x38] sm:$0xff] %v1492_v58   ;;  %v549_v18 = vld [vmem:[%s2305_s1 + $0x60] sm:$0xff]  ;;  %v1933_v39 = vadd.s32 104, %v1911_v32  ;;  %34 = vst.msk [vmem:[#allocation3 + $0x10] sm:$0xff] %vm2310_vm11, %v1731_v50  ;;  %p1712_p4 = pnand %p1711_p3, %p1705_p0 }
  0x1a   :  { %700 = vperm.xlu0 %1580, %v544_v59   ;;  %v1888_v24 = vld [vmem:[%s2306_s2 + $0x1] ss:$0 sm:$0xff]  ;;  %v1893_v25 = vld [vmem:[%s2306_s2] ss:$0 sm:$0xff]  ;;  %vm509_vm2 = vcmp.ne.s32.totalorder %v1913_v33, %v1916_v34  ;;  %vm517_vm3 = vcmp.ne.s32.totalorder %v1913_v33, %v1919_v35  ;;  %vm510_vm4 = vcmp.ne.s32.totalorder %v1913_v33, %v1930_v38  ;;  %32 = vst.msk [vmem:[#allocation3] sm:$0xff] %vm2310_vm11, %v1731_v50  ;;  %33 = vst.msk [vmem:[#allocation3 + $0x8] sm:$0xff] %vm2310_vm11, %v1731_v50 }
  0x1b   :  { %v1592_v62 = vld [vmem:[#allocation2] sm:$0xff]   ;;  %592 = vperm.xlu1 %1579, %v544_v59   ;;  %vm518_vm5 = vcmp.ne.s32.totalorder %v1913_v33, %v1933_v39  ;;  %35 = vst.msk [vmem:[#allocation3 + $0x18] sm:$0xff] %vm2310_vm11, %v1731_v50  ;;  %36 = vst.msk [vmem:[#allocation3 + $0x20] sm:$0xff] %vm2310_vm11, %v1731_v50  ;;  %s1354_s2 = sld [smem:[#allocation7 + $0x1]] }
  0x1c   :  { %v1593_v63 = vld [vmem:[#allocation2 + $0x20] sm:$0xff]   ;;  %1540 = vmatprep.mubr.bf16.mxu0 %v1592_v62  ;;  %v1594_v10 = vld [vmem:[#allocation2 + $0x8] sm:$0xff]   ;;  %37 = vst.msk [vmem:[#allocation3 + $0x28] sm:$0xff] %vm2310_vm11, %v1731_v50  ;;  %38 = vst.msk [vmem:[#allocation3 + $0x30] sm:$0xff] %vm2310_vm11, %v1731_v50 }
  0x1d   :  { %1548 = vmatprep.mubr.bf16.mxu1 %v1593_v63  ;;  %v1595_v11 = vld [vmem:[#allocation2 + $0x28] sm:$0xff]   ;;  %39 = vst.msk [vmem:[#allocation3 + $0x38] sm:$0xff] %vm2310_vm11, %v1731_v50  ;;  %40 = vst.msk [vmem:[#allocation3 + $0x40] sm:$0xff] %vm2310_vm11, %v1731_v50 }
  0x1e   :  { %708 = vperm.xlu0 %1580, %v546_v61   ;;  %v1597_v14 = vld [vmem:[#allocation2 + $0x30] sm:$0xff]   ;;  %41 = vst.msk [vmem:[#allocation3 + $0x48] sm:$0xff] %vm2310_vm11, %v1731_v50  ;;  %42 = vst.msk [vmem:[#allocation3 + $0x50] sm:$0xff] %vm2310_vm11, %v1731_v50 }
  0x1f   :  { %1531 = vmatpush3.bf16.xpose.msra.mxu0 %v1587_v37  ;;  %602 = vperm.xlu1 %1579, %v546_v61   ;;  %v1598_v16 = vld [vmem:[#allocation2 + $0x18] sm:$0xff]   ;;  %43 = vst.msk [vmem:[#allocation3 + $0x58] sm:$0xff] %vm2310_vm11, %v1731_v50  ;;  %44 = vst.msk [vmem:[#allocation3 + $0x60] sm:$0xff] %vm2310_vm11, %v1731_v50 }
  0x20   :  { %1567 = vmatpush3.bf16.xpose.msra.mxu1 %v1587_v37  ;;  %1532 = vmatprep.subr.bf16.mxu0 %v1588_v60  ;;  %v1599_v17 = vld [vmem:[#allocation2 + $0x38] sm:$0xff]   ;;  %45 = vst.msk [vmem:[#allocation3 + $0x68] sm:$0xff] %vm2310_vm11, %v1731_v50  ;;  %46 = vst.msk [vmem:[#allocation3 + $0x70] sm:$0xff] %vm2310_vm11, %v1731_v50 }
  0x21   :  { %1560 = vmatprep.subr.bf16.mxu1 %v1588_v60  ;;  %47 = vst.msk [vmem:[#allocation3 + $0x78] sm:$0xff] %vm2310_vm11, %v1731_v50  ;;  %48 = vst.msk [vmem:[#allocation4] sm:$0xff] %vm2310_vm11, %v1731_v50 }
  0x22   :  { %716 = vperm.xlu0 %1580, %v548_v0   ;;  %49 = vst.msk [vmem:[#allocation4 + $0x8] sm:$0xff] %vm2310_vm11, %v1731_v50  ;;  %50 = vst.msk [vmem:[#allocation4 + $0x10] sm:$0xff] %vm2310_vm11, %v1731_v50 }
  0x23   :  { %612 = vperm.xlu1 %1579, %v548_v0   ;;  %51 = vst.msk [vmem:[#allocation4 + $0x18] sm:$0xff] %vm2310_vm11, %v1731_v50  ;;  %52 = vst.msk [vmem:[#allocation4 + $0x20] sm:$0xff] %vm2310_vm11, %v1731_v50 }
  0x24   :  { %53 = vst.msk [vmem:[#allocation4 + $0x28] sm:$0xff] %vm2310_vm11, %v1731_v50  ;;  %54 = vst.msk [vmem:[#allocation4 + $0x30] sm:$0xff] %vm2310_vm11, %v1731_v50 }
  0x25   :  { %55 = vst.msk [vmem:[#allocation4 + $0x38] sm:$0xff] %vm2310_vm11, %v1731_v50  ;;  %56 = vst.msk [vmem:[#allocation4 + $0x40] sm:$0xff] %vm2310_vm11, %v1731_v50 }
  0x26   :  { %724 = vperm.xlu0 %1580, %v550_v4   ;;  %57 = vst.msk [vmem:[#allocation4 + $0x48] sm:$0xff] %vm2310_vm11, %v1731_v50  ;;  %58 = vst.msk [vmem:[#allocation4 + $0x50] sm:$0xff] %vm2310_vm11, %v1731_v50 }
  0x27   :  { %1533 = vmatpush3.bf16.xpose.msra.mxu0 %v1588_v60  ;;  %622 = vperm.xlu1 %1579, %v550_v4   ;;  %59 = vst.msk [vmem:[#allocation4 + $0x58] sm:$0xff] %vm2310_vm11, %v1731_v50  ;;  %60 = vst.msk [vmem:[#allocation4 + $0x60] sm:$0xff] %vm2310_vm11, %v1731_v50 }
  0x28   :  { %1568 = vmatpush3.bf16.xpose.msra.mxu1 %v1588_v60  ;;  %1534 = vmatprep.subr.bf16.mxu0 %v1589_v1  ;;  %61 = vst.msk [vmem:[#allocation4 + $0x68] sm:$0xff] %vm2310_vm11, %v1731_v50  ;;  %62 = vst.msk [vmem:[#allocation4 + $0x70] sm:$0xff] %vm2310_vm11, %v1731_v50 }
  0x29   :  { %1561 = vmatprep.subr.bf16.mxu1 %v1589_v1  ;;  %63 = vst.msk [vmem:[#allocation4 + $0x78] sm:$0xff] %vm2310_vm11, %v1731_v50  ;;  %64 = vst.msk [vmem:[#allocation5] sm:$0xff] %vm2310_vm11, %v1731_v50 }
  0x2a   :  { %732 = vperm.xlu0 %1580, %v552_v5   ;;  %65 = vst.msk [vmem:[#allocation5 + $0x8] sm:$0xff] %vm2310_vm11, %v1731_v50  ;;  %66 = vst.msk [vmem:[#allocation5 + $0x10] sm:$0xff] %vm2310_vm11, %v1731_v50 }
  0x2b   :  { %632 = vperm.xlu1 %1579, %v552_v5   ;;  %67 = vst.msk [vmem:[#allocation5 + $0x18] sm:$0xff] %vm2310_vm11, %v1731_v50  ;;  %68 = vst.msk [vmem:[#allocation5 + $0x20] sm:$0xff] %vm2310_vm11, %v1731_v50 }
  0x2c   :  { %69 = vst.msk [vmem:[#allocation5 + $0x28] sm:$0xff] %vm2310_vm11, %v1731_v50  ;;  %70 = vst.msk [vmem:[#allocation5 + $0x30] sm:$0xff] %vm2310_vm11, %v1731_v50 }
  0x2d   :  { %71 = vst.msk [vmem:[#allocation5 + $0x38] sm:$0xff] %vm2310_vm11, %v1731_v50  ;;  %72 = vst.msk [vmem:[#allocation5 + $0x40] sm:$0xff] %vm2310_vm11, %v1731_v50 }
  0x2e   :  { %1582 = vset.pattern.permute.xlu0 %v1730_v3  ;;  %73 = vst.msk [vmem:[#allocation5 + $0x48] sm:$0xff] %vm2310_vm11, %v1731_v50  ;;  %74 = vst.msk [vmem:[#allocation5 + $0x50] sm:$0xff] %vm2310_vm11, %v1731_v50 }
  0x2f   :  { %1535 = vmatpush3.bf16.xpose.msra.mxu0 %v1589_v1  ;;  %1581 = vset.pattern.permute.xlu1 %v1729_v2  ;;  %v543_v2 = vld [vmem:[%s2305_s1 + $0x30] sm:$0xff]  ;;  %75 = vst.msk [vmem:[#allocation5 + $0x58] sm:$0xff] %vm2310_vm11, %v1731_v50  ;;  %76 = vst.msk [vmem:[#allocation5 + $0x60] sm:$0xff] %vm2310_vm11, %v1731_v50 }
  0x30   :  { %1569 = vmatpush3.bf16.xpose.msra.mxu1 %v1589_v1  ;;  %1536 = vmatprep.subr.bf16.mxu0 %v1590_v6  ;;  %77 = vst.msk [vmem:[#allocation5 + $0x68] sm:$0xff] %vm2310_vm11, %v1731_v50  ;;  %78 = vst.msk [vmem:[#allocation5 + $0x70] sm:$0xff] %vm2310_vm11, %v1731_v50 }
  0x31   :  { %1562 = vmatprep.subr.bf16.mxu1 %v1590_v6  ;;  %557 = vperm.xlu0 %1582, %v1803_v13   ;;  %v1596_v13 = vld [vmem:[#allocation2 + $0x10] sm:$0xff]   ;;  %79 = vst.msk [vmem:[#allocation5 + $0x78] sm:$0xff] %vm2310_vm11, %v1731_v50 }
  0x32   :  { %676 = vperm.xlu1 %1581, %v538_v7  }
  0x35   :  { %562 = vperm.xlu0 %1582, %v538_v7  }
  0x36   :  { %680 = vperm.xlu1 %1581, %v1811_v19   ;;  %v551_v19 = vld [vmem:[%s2305_s1 + $0x70] sm:$0xff]  ;;  %s2213_s1 = sld [smem:[#allocation7]] }
  0x37   :  { %1537 = vmatpush3.bf16.xpose.msra.mxu0 %v1590_v6 }
  0x38   :  { %1570 = vmatpush3.bf16.xpose.msra.mxu1 %v1590_v6  ;;  %1538 = vmatprep.subr.bf16.mxu0 %v1591_v8 }
  0x39   :  { %1563 = vmatprep.subr.bf16.mxu1 %v1591_v8  ;;  %577 = vperm.xlu0 %1582, %v541_v9  }
  0x3a   :  { %688 = vperm.xlu1 %1581, %v541_v9  }
  0x3c   :  { %s1048_s9 = ssub.f32 %s2213_s1, %s1354_s2 }
  0x3d   :  { %587 = vperm.xlu0 %1582, %v543_v2  }
  0x3e   :  { %696 = vperm.xlu1 %1581, %v543_v2  }
  0x3f   :  { %1539 = vmatpush3.bf16.xpose.msra.mxu0 %v1591_v8 }
  0x40   :  { %1571 = vmatpush3.bf16.xpose.msra.mxu1 %v1591_v8  ;;  %v469_v8 = vadd.s32 16, %v1911_v32 }
  0x41   :  { %597 = vperm.xlu0 %1582, %v545_v12  }
  0x42   :  { %704 = vperm.xlu1 %1581, %v545_v12   ;;  %vm507_vm12 = vcmp.ne.s32.totalorder %v1913_v33, %v469_v8 }
  0x45   :  { %607 = vperm.xlu0 %1582, %v547_v15  }
  0x46   :  { %1541 = vmatmul.mubr.bf16.vlgmr.msra.gmra.mxu0 %v1594_v10  ;;  %712 = vperm.xlu1 %1581, %v547_v15  }
  0x47   :  { %1549 = vmatmul.mubr.bf16.vlgmr.msra.gmra.mxu1 %v1595_v11  ;;  %1544 = vmatprep.mubr.bf16.mxu0 %v1596_v13 }
  0x48   :  { %1552 = vmatprep.mubr.bf16.mxu1 %v1597_v14 }
  0x49   :  { %617 = vperm.xlu0 %1582, %v549_v18  }
  0x4a   :  { %720 = vperm.xlu1 %1581, %v549_v18  }
  0x4d   :  { %627 = vperm.xlu0 %1582, %v551_v19  }
  0x4e   :  { %1545 = vmatmul.mubr.bf16.gmra.mxu0 %v1598_v16  ;;  %728 = vperm.xlu1 %1581, %v551_v19  }
  0x4f   :  { %1553 = vmatmul.mubr.bf16.gmra.mxu1 %v1599_v17  ;;  %v477_v17 = vadd.s32 80, %v1911_v32 }
  0x51   :  { %vm515_vm14 = vcmp.ne.s32.totalorder %v1913_v33, %v477_v17 }
  0x52   :  { %1583 = vset.pattern.permute.xlu1 %v1730_v3 }
  0x85   :  { %v1877_v20 = vpop.permute.xlu0 %672  ;;  %v1879_v21 = vpop.permute.xlu1 %567 }
  0x8d   :  { %v1881_v22 = vpop.permute.xlu0 %684 }
  0x8e   :  { %v1883_v23 = vpop.permute.xlu1 %572 }
  0x91   :  { %v1895_v26 = vpop.permute.xlu0 %692 }
  0x92   :  { %vm744_vm0 = vcmp.eq.f32.partialorder %v1895_v26, %v1888_v24  ;;  %v1899_v3 = vpop.permute.xlu1 %582 }
  0x93   :  { %vm644_vm1 = vcmp.eq.f32.partialorder %v1899_v3, %v1893_v25 }
  0x95   :  { %v1903_v27 = vpop.permute.xlu0 %700 }
  0x96   :  { %v1905_v28 = vpop.permute.xlu1 %592 }
  0x97   :  { %vm646_vm11 = vcmp.eq.f32.partialorder %v1905_v28, %v1893_v25  ;;  %v476_v28 = vadd.s32 72, %v1911_v32 }
  0x99   :  { %v1907_v30 = vpop.permute.xlu0 %708 }
  0x9a   :  { %v1909_v31 = vpop.permute.xlu1 %602 }
  0x9d   :  { %v1921_v36 = vpop.permute.xlu0 %716 }
  0x9e   :  { %v1923_v37 = vpop.permute.xlu1 %612 }
  0xa1   :  { %v1935_v40 = vpop.permute.xlu0 %724 }
  0xa2   :  { %v1937_v41 = vpop.permute.xlu1 %622 }
  0xa3   :  { %vm652_vm7 = vcmp.eq.f32.partialorder %v1937_v41, %v1893_v25 }
  0xa5   :  { %v1947_v42 = vpop.permute.xlu0 %732 }
  0xa6   :  { %v1949_v43 = vpop.permute.xlu1 %632 }
  0xac   :  { %v1953_v44 = vpop.permute.xlu0 %557 }
  0xad   :  { %v1955_v45 = vpop.permute.xlu1 %676 }
  0xb0   :  { %v1957_v46 = vpop.permute.xlu0 %562 }
  0xb1   :  { %v1959_v47 = vpop.permute.xlu1 %680 }
  0xb4   :  { %v1961_v48 = vpop.permute.xlu0 %577 }
  0xb5   :  { %v1963_v49 = vpop.permute.xlu1 %688  ;;  %vm643_vm9 = vcmp.eq.f32.partialorder %v1961_v48, %v1893_v25 }
  0xb6   :  { %vm743_vm10 = vcmp.eq.f32.partialorder %v1963_v49, %v1888_v24 }
  0xb8   :  { %v2019_v63 = vpop.permute.xlu0 %587 }
  0xb9   :  { %v2025_v5 = vpop.permute.xlu1 %696 }
  0xbc   :  { %v2030_v13 = vpop.permute.xlu0 %597 }
  0xbd   :  { %v2034_v18 = vpop.permute.xlu1 %704 }
 0x106   :  { %v1542_v51 = vpop.f32.mrf.mxu0 }
 0x107   :  { %v1550_v52 = vpop.f32.mrf.mxu1  ;;  %v438_v53 = vmul.f32 1.442695, %v1542_v51  ;;  %v470_v51 = vadd.s32 24, %v1911_v32 }
 0x108   :  { %v454_v54 = vmul.f32 1.442695, %v1550_v52  ;;  %v371_v55 = vpop.f32.mrf.mxu0 }
 0x109   :  { %v403_v56 = vpop.f32.mrf.mxu1  ;;  %1600 = vpow2.f32 %v438_v53  ;;  %v434_v57 = vmul.f32 1.442695, %v371_v55  ;;  %vm508_vm15 = vcmp.ne.s32.totalorder %v1913_v33, %v470_v51 }
 0x10a   :  { %1602 = vpow2.f32 %v454_v54  ;;  %v1543_v58 = vpop.f32.mrf.mxu0  ;;  %v450_v10 = vmul.f32 1.442695, %v403_v56 }
 0x10b   :  { %v1551_v59 = vpop.f32.mrf.mxu1  ;;  %1604 = vpow2.f32 %v434_v57  ;;  %v440_v60 = vmul.f32 1.442695, %v1543_v58  ;;  %v608_v58 = vpop.permute.xlu0 %607 }
 0x10c   :  { %v2017_v61 = vpop.f32.mrf.mxu0  ;;  %v456_v0 = vmul.f32 1.442695, %v1551_v59  ;;  %v478_v59 = vadd.s32 88, %v1911_v32  ;;  %vm649_vm8 = vcmp.eq.f32.partialorder %v608_v58, %v1893_v25 }
 0x10d   :  { %v406_v62 = vpop.f32.mrf.mxu1  ;;  %1606 = vpow2.f32 %v440_v60  ;;  %v2045_v60 = vpop.permute.xlu1 %712  ;;  %v436_v17 = vmul.f32 1.442695, %v2017_v61 }
 0x10e   :  { %v2021_v1 = vpop.f32.mrf.mxu0  ;;  %1608 = vpow2.f32 %v456_v0  ;;  %v452_v55 = vmul.f32 1.442695, %v406_v62 }
 0x10f   :  { %v2023_v4 = vpop.f32.mrf.mxu1 }
 0x110   :  { %v387_v6 = vpop.f32.mrf.mxu0 }
 0x111   :  { %v419_v7 = vpop.f32.mrf.mxu1  ;;  %v442_v9 = vmul.f32 1.442695, %v387_v6  ;;  %v474_v6 = vadd.s32 56, %v1911_v32 }
 0x112   :  { %v458_v2 = vmul.f32 1.442695, %v419_v7  ;;  %v1547_v11 = vpop.f32.mrf.mxu0 }
 0x113   :  { %v2028_v12 = vpop.f32.mrf.mxu1  ;;  %1610 = vpow2.f32 %v442_v9  ;;  %v448_v14 = vmul.f32 1.442695, %v1547_v11 }
 0x114   :  { %1612 = vpow2.f32 %v458_v2  ;;  %v390_v15 = vpop.f32.mrf.mxu0  ;;  %v618_v2 = vpop.permute.xlu0 %617 }
 0x115   :  { %v422_v16 = vpop.f32.mrf.mxu1  ;;  %1614 = vpow2.f32 %v448_v14  ;;  %v444_v19 = vmul.f32 1.442695, %v390_v15  ;;  %vm651_vm6 = vcmp.eq.f32.partialorder %v618_v2, %v1893_v25 }
 0x116   :  { %v460_v29 = vmul.f32 1.442695, %v422_v16  ;;  %v1601_v50 = vpop.eup %1600  ;;  %1616 = vpow2.f32 %v450_v10  ;;  %v475_v10 = vadd.s32 64, %v1911_v32 }
 0x117   :  { %v1603_v52 = vpop.eup %1602  ;;  %1618 = vpow2.f32 %v444_v19  ;;  %v523_v53 = vsel %vm507_vm12, %v1601_v50, 0.0  ;;  %vm641_vm12 = vcmp.eq.f32.partialorder %v1879_v21, %v1893_v25  ;;  %v721_v21 = vpop.permute.xlu1 %720 }
 0x118   :  { %v1605_v54 = vpop.eup %1604  ;;  %1620 = vpow2.f32 %v460_v29  ;;  %791 = vadd.xlane.f32.xlu0 %v523_v53  ;;  %v531_v0 = vsel %vm515_vm14, %v1603_v52, 0.0  ;;  %v657_v62 = vsel %vm641_vm12, %v523_v53, 0.0  ;;  %vm642_vm14 = vcmp.eq.f32.partialorder %v1883_v23, %v1893_v25 }
 0x119   :  { %v2040_v56 = vsel %vm505_vm13, %v1605_v54, 0.0  ;;  %1622 = vpow2.f32 %v452_v55  ;;  %vm516_vm13 = vcmp.ne.s32.totalorder %v1913_v33, %v478_v59  ;;  %vm751_vm12 = vcmp.eq.f32.partialorder %v721_v21, %v1888_v24  ;;  %v628_v21 = vpop.permute.xlu0 %627 }
 0x11a   :  { %v1607_v57 = vpop.eup %1606  ;;  %787 = vadd.xlane.f32.xlu1 %v2040_v56  ;;  %v665_v50 = vsel %vm649_vm8, %v531_v0, 0.0  ;;  %1624 = vpow2.f32 %v436_v17  ;;  %vm639_vm8 = vcmp.eq.f32.partialorder %v1953_v44, %v1893_v25  ;;  %v462_v44 = vmul.f32 1.442695, %v2023_v4  ;;  %v771_v17 = vld [vmem:[#allocation3] sm:$0xff] }
 0x11b   :  { %v524_v7 = vsel %vm508_vm15, %v1607_v57, 0.0  ;;  %v1609_v8 = vpop.eup %1608  ;;  %vm512_vm15 = vcmp.ne.s32.totalorder %v1913_v33, %v474_v6 }
 0x11c   :  { %807 = vadd.xlane.f32.xlu0 %v531_v0  ;;  %v532_v14 = vsel %vm516_vm13, %v1609_v8, 0.0  ;;  %v658_v49 = vsel %vm642_vm14, %v524_v7, 0.0  ;;  %v468_v0 = vadd.s32 8, %v1911_v32  ;;  %vm640_vm13 = vcmp.eq.f32.partialorder %v1957_v46, %v1893_v25 }
 0x11d   :  { %vm739_vm14 = vcmp.eq.f32.partialorder %v1877_v20, %v1888_v24  ;;  %v473_v20 = vadd.s32 48, %v1911_v32 }
 0x11e   :  { %793 = vadd.xlane.f32.xlu1 %v524_v7  ;;  %v446_v7 = vmul.f32 1.442695, %v2021_v1  ;;  %v464_v1 = vmul.f32 1.442695, %v2028_v12 }
 0x120   :  { %v1611_v9 = vpop.eup %1610  ;;  %872 = vadd.xlane.f32.xlu0 %v657_v62  ;;  %1626 = vpow2.f32 %v446_v7 }
 0x121   :  { %v1613_v11 = vpop.eup %1612  ;;  %v2062_v15 = vsel %vm509_vm2, %v1611_v9, 0.0  ;;  %vm746_vm2 = vcmp.eq.f32.partialorder %v1903_v27, %v1888_v24  ;;  %1628 = vpow2.f32 %v462_v44  ;;  %v482_v9 = vadd.s32 120, %v1911_v32  ;;  %v935_v44 = vld [vmem:[#allocation5 + $0x18] sm:$0xff] }
 0x122   :  { %v1615_v16 = vpop.eup %1614  ;;  %809 = vadd.xlane.f32.xlu1 %v532_v14  ;;  %v2069_v19 = vsel %vm517_vm3, %v1613_v11, 0.0  ;;  %v2075_v29 = vsel %vm643_vm9, %v2062_v15, 0.0  ;;  %vm513_vm3 = vcmp.ne.s32.totalorder %v1913_v33, %v475_v10  ;;  %vm506_vm9 = vcmp.ne.s32.totalorder %v1913_v33, %v468_v0 }
 0x123   :  { %v1617_v34 = vpop.eup %1616  ;;  %v2077_v51 = vsel %vm512_vm15, %v1615_v16, 0.0  ;;  %v2080_v61 = vsel %vm651_vm6, %v2069_v19, 0.0  ;;  %v2086_v35 = vsel %vm743_vm10, %v2075_v29, 0.0  ;;  %vm514_vm6 = vcmp.ne.s32.totalorder %v1913_v33, %v476_v28 }
 0x124   :  { %v1619_v52 = vpop.eup %1618  ;;  %888 = vadd.xlane.f32.xlu0 %v665_v50  ;;  %v2095_v48 = vsel %vm646_vm11, %v2077_v51, 0.0  ;;  %v2098_v53 = vsel %vm751_vm12, %v2080_v61, 0.0  ;;  %v529_v38 = vsel %vm513_vm3, %v1617_v34, 0.0  ;;  %vm750_vm10 = vcmp.eq.f32.partialorder %v1921_v36, %v1888_v24  ;;  %v781_v34 = vld [vmem:[#allocation3 + $0x50] sm:$0xff] }
 0x125   :  { %v1621_v54 = vpop.eup %1620  ;;  %v2106_v27 = vsel %vm510_vm4, %v1619_v52, 0.0  ;;  %v2109_v55 = vsel %vm746_vm2, %v2095_v48, 0.0  ;;  %vm650_vm4 = vcmp.eq.f32.partialorder %v1923_v37, %v1893_v25  ;;  %vm647_vm11 = vcmp.eq.f32.partialorder %v2030_v13, %v1893_v25 }
 0x126   :  { %874 = vadd.xlane.f32.xlu1 %v658_v49  ;;  %v2115_v57 = vsel %vm518_vm5, %v1621_v54, 0.0  ;;  %v2121_v23 = vsel %vm644_vm1, %v2106_v27, 0.0  ;;  %vm741_vm1 = vcmp.eq.f32.partialorder %v1959_v47, %v1888_v24  ;;  %vm2311_vm5 = vcmp.eq.f32.partialorder %v1935_v40, %v1888_v24  ;;  %v1623_v59 = vpop.eup %1622 }
 0x127   :  { %v2127_v58 = vsel %vm652_vm7, %v2115_v57, 0.0  ;;  %v2133_v39 = vsel %vm744_vm0, %v2121_v23, 0.0  ;;  %v666_v41 = vsel %vm650_vm4, %v532_v14, 0.0  ;;  %v757_v26 = vsel %vm741_vm1, %v657_v62, 0.0  ;;  %v1625_v6 = vpop.eup %1624 }
 0x128   :  { %803 = vadd.xlane.f32.xlu0 %v529_v38  ;;  %v2143_v3 = vsel %vm2311_vm5, %v2127_v58, 0.0  ;;  %vm749_vm0 = vcmp.eq.f32.partialorder %v2045_v60, %v1888_v24  ;;  %v530_v37 = vsel %vm514_vm6, %v1623_v59, 0.0  ;;  %vm742_vm7 = vcmp.eq.f32.partialorder %v1881_v22, %v1888_v24 }
 0x129   :  { %v765_v47 = vsel %vm749_vm0, %v665_v50, 0.0  ;;  %v758_v40 = vsel %vm742_vm7, %v658_v49, 0.0  ;;  %v655_v60 = vsel %vm639_vm8, %v2040_v56, 0.0  ;;  %v766_v8 = vsel %vm750_vm10, %v666_v41, 0.0 }
 0x12a   :  { %890 = vadd.xlane.f32.xlu1 %v666_v41  ;;  %v522_v22 = vsel %vm506_vm9, %v1625_v6, 0.0  ;;  %v663_v62 = vsel %vm647_vm11, %v529_v38, 0.0  ;;  %v755_v36 = vsel %vm739_vm14, %v655_v60, 0.0  ;;  %vm648_vm15 = vcmp.eq.f32.partialorder %v1909_v31, %v1893_v25  ;;  %v863_v41 = vld [vmem:[#allocation4 + $0x58] sm:$0xff] }
 0x12b   :  { %v656_v56 = vsel %vm640_vm13, %v522_v22, 0.0  ;;  %vm747_vm12 = vcmp.eq.f32.partialorder %v2034_v18, %v1888_v24  ;;  %1630 = vpow2.f32 %v464_v1  ;;  %v664_v4 = vsel %vm648_vm15, %v530_v37, 0.0 }
 0x12c   :  { %952 = vadd.xlane.f32.xlu0 %v757_v26  ;;  %v763_v46 = vsel %vm747_vm12, %v663_v62, 0.0  ;;  %vm740_vm2 = vcmp.eq.f32.partialorder %v1955_v45, %v1888_v24  ;;  %vm748_vm3 = vcmp.eq.f32.partialorder %v1907_v30, %v1888_v24  ;;  %vm511_vm4 = vcmp.ne.s32.totalorder %v1913_v33, %v473_v20 }
 0x12d   :  { %v756_v12 = vsel %vm740_vm2, %v656_v56, 0.0  ;;  %v1627_v13 = vpop.eup %1626  ;;  %v481_v31 = vadd.s32 112, %v1911_v32  ;;  %v764_v18 = vsel %vm748_vm3, %v664_v4, 0.0  ;;  %vm520_vm5 = vcmp.ne.s32.totalorder %v1913_v33, %v482_v9 }
 0x12e   :  { %805 = vadd.xlane.f32.xlu1 %v530_v37  ;;  %v527_v2 = vsel %vm511_vm4, %v1627_v13, 0.0  ;;  %v1629_v45 = vpop.eup %1628  ;;  %vm645_vm6 = vcmp.eq.f32.partialorder %v2019_v63, %v1893_v25  ;;  %vm653_vm0 = vcmp.eq.f32.partialorder %v628_v21, %v1893_v25  ;;  %vm654_vm7 = vcmp.eq.f32.partialorder %v1949_v43, %v1893_v25  ;;  %v729_v25 = vpop.permute.xlu1 %728  ;;  %v934_v37 = vld [vmem:[#allocation5 + $0x10] sm:$0xff] }
 0x12f   :  { %vm519_vm1 = vcmp.ne.s32.totalorder %v1913_v33, %v481_v31  ;;  %v661_v14 = vsel %vm645_vm6, %v527_v2, 0.0  ;;  %vm745_vm8 = vcmp.eq.f32.partialorder %v2025_v5, %v1888_v24  ;;  %vm753_vm9 = vcmp.eq.f32.partialorder %v729_v25, %v1888_v24 }
 0x130   :  { %968 = vadd.xlane.f32.xlu0 %v765_v47  ;;  %v535_v30 = vsel %vm519_vm1, %v1629_v45, 0.0  ;;  %v761_v63 = vsel %vm745_vm8, %v661_v14, 0.0  ;;  %vm2312_vm10 = vcmp.eq.f32.partialorder %v1947_v42, %v1888_v24  ;;  %vm2313_vm11 = vcmask 7168  }
 0x131   :  { %v669_v32 = vsel %vm653_vm0, %v535_v30, 0.0  ;;  %vm2314_vm13 = vmmov %vm2313_vm11  ;;  %v2224_v13 = vstv %s1048_s9 }
 0x132   :  { %954 = vadd.xlane.f32.xlu1 %v758_v40  ;;  %v769_v43 = vsel %vm753_vm9, %v669_v32, 0.0  ;;  %vm2315_vm14 = vmmov %vm2313_vm11  ;;  %v780_v40 = vld [vmem:[#allocation3 + $0x48] sm:$0xff] }
 0x133   :  { %vm2316_vm15 = vmmov %vm2313_vm11 }
 0x134   :  { %868 = vadd.xlane.f32.xlu0 %v655_v60  ;;  %vm2317_vm12 = vmmov %vm2313_vm11  ;;  %v942_v60 = vld [vmem:[#allocation5 + $0x50] sm:$0xff] }
 0x135   :  { %vm2318_vm2 = vmmov %vm2313_vm11 }
 0x136   :  { %970 = vadd.xlane.f32.xlu1 %v766_v8  ;;  %vm2319_vm3 = vmmov %vm2318_vm2 }
 0x137   :  { %vm2320_vm4 = vmmov %vm2318_vm2 }
 0x138   :  { %884 = vadd.xlane.f32.xlu0 %v663_v62  ;;  %v1631_v10 = vpop.eup %1630  ;;  %vm2321_vm1 = vmmov %vm2318_vm2 }
 0x139   :  { %v536_v11 = vsel %vm520_vm5, %v1631_v10, 0.0  ;;  %vm2322_vm5 = vmmov %vm2321_vm1 }
 0x13a   :  { %870 = vadd.xlane.f32.xlu1 %v656_v56  ;;  %v670_v33 = vsel %vm654_vm7, %v536_v11, 0.0  ;;  %vm2323_vm6 = vmmov %vm2321_vm1  ;;  %v852_v56 = vld [vmem:[#allocation4] sm:$0xff] }
 0x13b   :  { %v770_v5 = vsel %vm2312_vm10, %v670_v33, 0.0  ;;  %vm2324_vm0 = vmmov %vm2321_vm1 }
 0x13c   :  { %948 = vadd.xlane.f32.xlu0 %v755_v36  ;;  %vm2325_vm7 = vmmov %vm2324_vm0 }
 0x13d   :  { %vm2326_vm8 = vmmov %vm2324_vm0 }
 0x13e   :  { %886 = vadd.xlane.f32.xlu1 %v664_v4  ;;  %vm2327_vm9 = vmmov %vm2324_vm0 }
 0x13f   :  { %vm2328_vm10 = vmmov %vm2324_vm0 }
 0x140   :  { %964 = vadd.xlane.f32.xlu0 %v763_v46  ;;  %v943_v46 = vld [vmem:[#allocation5 + $0x58] sm:$0xff] }
 0x142   :  { %950 = vadd.xlane.f32.xlu1 %v756_v12  ;;  %v2222_v12 = vstv %s1354_s2 }
 0x144   :  { %789 = vadd.xlane.f32.xlu0 %v522_v22 }
 0x146   :  { %966 = vadd.xlane.f32.xlu1 %v764_v18 }
 0x148   :  { %799 = vadd.xlane.f32.xlu0 %v527_v2  ;;  %v860_v2 = vld [vmem:[#allocation4 + $0x40] sm:$0xff] }
 0x14a   :  { %801 = vadd.xlane.f32.xlu1 %v2077_v51 }
 0x14c   :  { %815 = vadd.xlane.f32.xlu0 %v535_v30 }
 0x14e   :  { %817 = vadd.xlane.f32.xlu1 %v536_v11 }
 0x150   :  { %880 = vadd.xlane.f32.xlu0 %v661_v14 }
 0x152   :  { %882 = vadd.xlane.f32.xlu1 %v2095_v48  ;;  %v854_v48 = vld [vmem:[#allocation4 + $0x10] sm:$0xff] }
 0x154   :  { %896 = vadd.xlane.f32.xlu0 %v669_v32 }
 0x156   :  { %898 = vadd.xlane.f32.xlu1 %v670_v33 }
 0x158   :  { %795 = vadd.xlane.f32.xlu0 %v2062_v15  ;;  %v773_v15 = vld [vmem:[#allocation3 + $0x10] sm:$0xff] }
 0x15a   :  { %797 = vadd.xlane.f32.xlu1 %v2106_v27  ;;  %v862_v27 = vld [vmem:[#allocation4 + $0x50] sm:$0xff] }
 0x15c   :  { %811 = vadd.xlane.f32.xlu0 %v2069_v19 }
 0x15e   :  { %813 = vadd.xlane.f32.xlu1 %v2115_v57  ;;  %v855_v57 = vld [vmem:[#allocation4 + $0x18] sm:$0xff] }
 0x160   :  { %960 = vadd.xlane.f32.xlu0 %v761_v63  ;;  %v853_v63 = vld [vmem:[#allocation4 + $0x8] sm:$0xff] }
 0x162   :  { %962 = vadd.xlane.f32.xlu1 %v2109_v55 }
 0x164   :  { %876 = vadd.xlane.f32.xlu0 %v2075_v29 }
 0x166   :  { %878 = vadd.xlane.f32.xlu1 %v2121_v23 }
 0x168   :  { %892 = vadd.xlane.f32.xlu0 %v2080_v61  ;;  %v774_v61 = vld [vmem:[#allocation3 + $0x18] sm:$0xff] }
 0x16a   :  { %894 = vadd.xlane.f32.xlu1 %v2127_v58  ;;  %v779_v58 = vld [vmem:[#allocation3 + $0x40] sm:$0xff] }
 0x16c   :  { %956 = vadd.xlane.f32.xlu0 %v2086_v35 }
 0x16e   :  { %958 = vadd.xlane.f32.xlu1 %v2133_v39 }
 0x170   :  { %972 = vadd.xlane.f32.xlu0 %v2098_v53  ;;  %v782_v53 = vld [vmem:[#allocation3 + $0x58] sm:$0xff] }
 0x172   :  { %974 = vadd.xlane.f32.xlu1 %v2143_v3 }
 0x174   :  { %976 = vadd.xlane.f32.xlu0 %v769_v43 }
 0x176   :  { %978 = vadd.xlane.f32.xlu1 %v770_v5 }
 0x1a1   :  { %v792_v16 = vpop.xlane.xlu0 %791 }
 0x1a2   :  { %v821_v19 = vadd.f32 %v792_v16, %v773_v15  ;;  %v932_v16 = vld [vmem:[#allocation5] sm:$0xff] }
 0x1a3   :  { %v788_v29 = vpop.xlane.xlu1 %787 }
 0x1a4   :  { %838 = vst.msk [vmem:[#allocation3 + $0x10] sm:$0xff] %vm2313_vm11, %v821_v19  ;;  %v819_v50 = vadd.f32 %v788_v29, %v771_v17  ;;  %vm2329_vm11 = vmmov %vm2324_vm0 }
 0x1a5   :  { %v808_v51 = vpop.xlane.xlu0 %807 }
 0x1a6   :  { %836 = vst.msk [vmem:[#allocation3] sm:$0xff] %vm2314_vm13, %v819_v50  ;;  %v829_v35 = vadd.f32 %v808_v51, %v781_v34  ;;  %vm2330_vm13 = vmmov %vm2324_vm0 }
 0x1a7   :  { %v794_v52 = vpop.xlane.xlu1 %793 }
 0x1a8   :  { %846 = vst.msk [vmem:[#allocation3 + $0x50] sm:$0xff] %vm2315_vm14, %v829_v35  ;;  %v822_v24 = vadd.f32 %v794_v52, %v774_v61  ;;  %v861_v35 = vld [vmem:[#allocation4 + $0x48] sm:$0xff]  ;;  %vm2331_vm14 = vmmov %vm2324_vm0 }
 0x1a9   :  { %v873_v42 = vpop.xlane.xlu0 %872 }
 0x1aa   :  { %839 = vst.msk [vmem:[#allocation3 + $0x18] sm:$0xff] %vm2316_vm15, %v822_v24  ;;  %v902_v54 = vadd.f32 %v873_v42, %v854_v48  ;;  %vm2332_vm15 = vmmov %vm2324_vm0 }
 0x1ab   :  { %v810_v49 = vpop.xlane.xlu1 %809  ;;  %v1100_v31 = vld [vmem:[#allocation3 + $0x10] sm:$0xff] }
 0x1ac   :  { %918 = vst.msk [vmem:[#allocation4 + $0x10] sm:$0xff] %vm2317_vm12, %v902_v54  ;;  %v830_v55 = vadd.f32 %v810_v49, %v782_v53  ;;  %v1392_v21 = vadd.f32 -120.0, %v1100_v31  ;;  %v940_v49 = vld [vmem:[#allocation5 + $0x40] sm:$0xff]  ;;  %vm2333_vm12 = vmmov %vm2324_vm0 }
 0x1ad   :  { %v889_v28 = vpop.xlane.xlu0 %888 }
 0x1ae   :  { %847 = vst.msk [vmem:[#allocation3 + $0x58] sm:$0xff] %vm2318_vm2, %v830_v55  ;;  %v910_v23 = vadd.f32 %v889_v28, %v862_v27  ;;  %vm2334_vm2 = vmmov %vm2324_vm0 }
 0x1af   :  { %v875_v38 = vpop.xlane.xlu1 %874  ;;  %v1108_v32 = vld [vmem:[#allocation3 + $0x50] sm:$0xff] }
 0x1b0   :  { %926 = vst.msk [vmem:[#allocation4 + $0x50] sm:$0xff] %vm2319_vm3, %v910_v23  ;;  %v903_v39 = vadd.f32 %v875_v38, %v855_v57  ;;  %v1400_v29 = vadd.f32 -120.0, %v1108_v32  ;;  %vm2335_vm3 = vmmov %vm2324_vm0 }
 0x1b1   :  { %v804_v3 = vpop.xlane.xlu0 %803  ;;  %v1101_v23 = vld [vmem:[#allocation3 + $0x18] sm:$0xff] }
 0x1b2   :  { %919 = vst.msk [vmem:[#allocation4 + $0x18] sm:$0xff] %vm2320_vm4, %v903_v39  ;;  %v827_v59 = vadd.f32 %v804_v3, %v779_v58  ;;  %v933_v58 = vld [vmem:[#allocation5 + $0x8] sm:$0xff]  ;;  %vm2336_vm4 = vmmov %vm2324_vm0 }
 0x1b3   :  { %v891_v26 = vpop.xlane.xlu1 %890  ;;  %v1017_v20 = vld [vmem:[#allocation4 + $0x10] sm:$0xff] }
 0x1b4   :  { %844 = vst.msk [vmem:[#allocation3 + $0x40] sm:$0xff] %vm2321_vm1, %v827_v59  ;;  %v911_v47 = vadd.f32 %v891_v26, %v863_v41  ;;  %v1034_v30 = vmul.f32 %v2222_v12, %v1017_v20  ;;  %v1132_v5 = vsub.f32 %v1392_v21, %v1017_v20  ;;  %v778_v21 = vld [vmem:[#allocation3 + $0x38] sm:$0xff]  ;;  %vm2337_vm1 = vmmov %vm2324_vm0 }
 0x1b5   :  { %v953_v0 = vpop.xlane.xlu0 %952  ;;  %v1109_v26 = vld [vmem:[#allocation3 + $0x58] sm:$0xff] }
 0x1b6   :  { %927 = vst.msk [vmem:[#allocation4 + $0x58] sm:$0xff] %vm2322_vm5, %v911_v47  ;;  %v982_v6 = vadd.f32 %v953_v0, %v934_v37  ;;  %v772_v47 = vld [vmem:[#allocation3 + $0x8] sm:$0xff]  ;;  %vm2338_vm5 = vmmov %vm2324_vm0 }
 0x1b7   :  { %v806_v7 = vpop.xlane.xlu1 %805  ;;  %v1025_v14 = vld [vmem:[#allocation4 + $0x50] sm:$0xff] }
 0x1b8   :  { %998 = vst.msk [vmem:[#allocation5 + $0x10] sm:$0xff] %vm2323_vm6, %v982_v6  ;;  %v828_v8 = vadd.f32 %v806_v7, %v780_v40  ;;  %v1042_v17 = vmul.f32 %v2222_v12, %v1025_v14  ;;  %v1140_v42 = vsub.f32 %v1400_v29, %v1025_v14  ;;  %v1393_v6 = vadd.f32 -120.0, %v1101_v23  ;;  %vm2339_vm6 = vmmov %vm2324_vm0 }
 0x1b9   :  { %v969_v22 = vpop.xlane.xlu0 %968  ;;  %v1018_v53 = vld [vmem:[#allocation4 + $0x18] sm:$0xff] }
 0x1ba   :  { %845 = vst.msk [vmem:[#allocation3 + $0x48] sm:$0xff] %vm2324_vm0, %v828_v8  ;;  %v990_v62 = vadd.f32 %v969_v22, %v942_v60  ;;  %v1035_v3 = vmul.f32 %v2222_v12, %v1018_v53  ;;  %v941_v8 = vld [vmem:[#allocation5 + $0x48] sm:$0xff] }
 0x1bb   :  { %v955_v1 = vpop.xlane.xlu1 %954 }
 0x1bc   :  { %1006 = vst.msk [vmem:[#allocation5 + $0x50] sm:$0xff] %vm2325_vm7, %v990_v62  ;;  %v983_v36 = vadd.f32 %v955_v1, %v935_v44  ;;  %v1098_v44 = vld [vmem:[#allocation3] sm:$0xff]  ;;  %v1401_v1 = vadd.f32 -120.0, %v1109_v26  ;;  %vm2340_vm7 = vmmov %vm2324_vm0 }
 0x1bd   :  { %v869_v4 = vpop.xlane.xlu0 %868  ;;  %v1026_v57 = vld [vmem:[#allocation4 + $0x58] sm:$0xff] }
 0x1be   :  { %999 = vst.msk [vmem:[#allocation5 + $0x18] sm:$0xff] %vm2326_vm8, %v983_v36  ;;  %v900_v18 = vadd.f32 %v869_v4, %v852_v56  ;;  %v1043_v0 = vmul.f32 %v2222_v12, %v1026_v57  ;;  %v1133_v56 = vsub.f32 %v1393_v6, %v1018_v53  ;;  %v1141_v31 = vsub.f32 %v1401_v1, %v1026_v57  ;;  %v859_v6 = vld [vmem:[#allocation4 + $0x38] sm:$0xff]  ;;  %vm2341_vm8 = vmmov %vm2324_vm0 }
 0x1bf   :  { %v971_v9 = vpop.xlane.xlu1 %970  ;;  %v1051_v45 = vld [vmem:[#allocation5 + $0x10] sm:$0xff] }
 0x1c0   :  { %916 = vst.msk [vmem:[#allocation4] sm:$0xff] %vm2327_vm9, %v900_v18  ;;  %v991_v10 = vadd.f32 %v971_v9, %v943_v46  ;;  %v1068_v11 = vmul.f32 %v2224_v13, %v1051_v45  ;;  %v777_v46 = vld [vmem:[#allocation3 + $0x30] sm:$0xff]  ;;  %vm2342_vm9 = vmmov %vm2324_vm0 }
 0x1c1   :  { %v885_v33 = vpop.xlane.xlu0 %884  ;;  %v1107_v29 = vld [vmem:[#allocation3 + $0x48] sm:$0xff] }
 0x1c2   :  { %1007 = vst.msk [vmem:[#allocation5 + $0x58] sm:$0xff] %vm2328_vm10, %v991_v10  ;;  %v908_v25 = vadd.f32 %v885_v33, %v860_v2  ;;  %v1084_v43 = vadd.f32 %v1068_v11, %v1034_v30  ;;  %v1390_v10 = vadd.f32 -120.0, %v1098_v44  ;;  %vm2343_vm10 = vmmov %vm2324_vm0 }
 0x1c3   :  { %v871_v15 = vpop.xlane.xlu1 %870  ;;  %v1059_v19 = vld [vmem:[#allocation5 + $0x50] sm:$0xff] }
 0x1c4   :  { %924 = vst.msk [vmem:[#allocation4 + $0x40] sm:$0xff] %vm2329_vm11, %v908_v25  ;;  %v901_v34 = vadd.f32 %v871_v15, %v853_v63  ;;  %1632 = vlog2.f32 %v1084_v43  ;;  %v1180_v50 = vadd.f32 %v1132_v5, %v1084_v43  ;;  %v1076_v51 = vmul.f32 %v2224_v13, %v1059_v19  ;;  %v1106_v43 = vld [vmem:[#allocation3 + $0x40] sm:$0xff]  ;;  %vm2344_vm11 = vmmov %vm2324_vm0 }
 0x1c5   :  { %v949_v61 = vpop.xlane.xlu0 %948  ;;  %v1052_v52 = vld [vmem:[#allocation5 + $0x18] sm:$0xff] }
 0x1c6   :  { %917 = vst.msk [vmem:[#allocation4 + $0x8] sm:$0xff] %vm2330_vm13, %v901_v34  ;;  %v980_v48 = vadd.f32 %v949_v61, %v932_v16  ;;  %1634 = vlog2.f32 %v1180_v50  ;;  %v1092_v24 = vadd.f32 %v1076_v51, %v1042_v17  ;;  %v1069_v27 = vmul.f32 %v2224_v13, %v1052_v52  ;;  %v785_v16 = vld [vmem:[#allocation3 + $0x70] sm:$0xff]  ;;  %v786_v52 = vld [vmem:[#allocation3 + $0x78] sm:$0xff]  ;;  %vm2345_vm13 = vmmov %vm2324_vm0 }
 0x1c7   :  { %v887_v54 = vpop.xlane.xlu1 %886  ;;  %v1015_v22 = vld [vmem:[#allocation4] sm:$0xff] }
 0x1c8   :  { %996 = vst.msk [vmem:[#allocation5] sm:$0xff] %vm2331_vm14, %v980_v48  ;;  %v909_v55 = vadd.f32 %v887_v54, %v861_v35  ;;  %1636 = vlog2.f32 %v1092_v24  ;;  %v1188_v28 = vadd.f32 %v1140_v42, %v1092_v24  ;;  %v2241_v40 = vadd.f32 %v1069_v27, %v1035_v3  ;;  %vm2346_vm14 = vmmov %vm2324_vm0 }
 0x1c9   :  { %v965_v38 = vpop.xlane.xlu0 %964  ;;  %v1060_v39 = vld [vmem:[#allocation5 + $0x58] sm:$0xff]  ;;  %v1032_v2 = vmul.f32 %v2222_v12, %v1015_v22  ;;  %v1130_v63 = vsub.f32 %v1390_v10, %v1015_v22  ;;  %v1398_v42 = vadd.f32 -120.0, %v1106_v43 }
 0x1ca   :  { %925 = vst.msk [vmem:[#allocation4 + $0x48] sm:$0xff] %vm2332_vm15, %v909_v55  ;;  %v988_v41 = vadd.f32 %v965_v38, %v940_v49  ;;  %1638 = vlog2.f32 %v1188_v28  ;;  %v1077_v59 = vmul.f32 %v2224_v13, %v1060_v39  ;;  %v1181_v18 = vadd.f32 %v1133_v56, %v2241_v40  ;;  %v858_v38 = vld [vmem:[#allocation4 + $0x30] sm:$0xff]  ;;  %vm2347_vm15 = vmmov %vm2324_vm0 }
 0x1cb   :  { %v951_v37 = vpop.xlane.xlu1 %950  ;;  %v1023_v25 = vld [vmem:[#allocation4 + $0x40] sm:$0xff]  ;;  %v1399_v55 = vadd.f32 -120.0, %v1107_v29 }
 0x1cc   :  { %1004 = vst.msk [vmem:[#allocation5 + $0x40] sm:$0xff] %vm2333_vm12, %v988_v41  ;;  %v981_v7 = vadd.f32 %v951_v37, %v933_v58  ;;  %v1093_v62 = vadd.f32 %v1077_v59, %v1043_v0  ;;  %1640 = vlog2.f32 %v1181_v18  ;;  %v1040_v48 = vmul.f32 %v2222_v12, %v1023_v25  ;;  %vm2348_vm12 = vmmov %vm2324_vm0 }
 0x1cd   :  { %v790_v60 = vpop.xlane.xlu0 %789  ;;  %v1016_v28 = vld [vmem:[#allocation4 + $0x8] sm:$0xff]  ;;  %v1138_v39 = vsub.f32 %v1398_v42, %v1023_v25  ;;  %v938_v42 = vld [vmem:[#allocation5 + $0x30] sm:$0xff] }
 0x1ce   :  { %997 = vst.msk [vmem:[#allocation5 + $0x8] sm:$0xff] %vm2334_vm2, %v981_v7  ;;  %v820_v36 = vadd.f32 %v790_v60, %v772_v47  ;;  %v1189_v14 = vadd.f32 %v1141_v31, %v1093_v62  ;;  %v1033_v22 = vmul.f32 %v2222_v12, %v1016_v28  ;;  %v776_v25 = vld [vmem:[#allocation3 + $0x28] sm:$0xff]  ;;  %vm2349_vm2 = vmmov %vm2324_vm0 }
 0x1cf   :  { %v967_v4 = vpop.xlane.xlu1 %966  ;;  %v1049_v20 = vld [vmem:[#allocation5] sm:$0xff] }
 0x1d0   :  { %837 = vst.msk [vmem:[#allocation3 + $0x8] sm:$0xff] %vm2335_vm3, %v820_v36  ;;  %v989_v9 = vadd.f32 %v967_v4, %v941_v8  ;;  %v1066_v45 = vmul.f32 %v2224_v13, %v1049_v20  ;;  %v866_v4 = vld [vmem:[#allocation4 + $0x70] sm:$0xff]  ;;  %vm2350_vm3 = vmmov %vm2324_vm0 }
 0x1d1   :  { %v1633_v30 = vpop.eup %1632  ;;  %v800_v11 = vpop.xlane.xlu0 %799  ;;  %v1024_v27 = vld [vmem:[#allocation4 + $0x48] sm:$0xff] }
 0x1d2   :  { %1005 = vst.msk [vmem:[#allocation5 + $0x48] sm:$0xff] %vm2336_vm4, %v989_v9  ;;  %v825_v32 = vadd.f32 %v800_v11, %v777_v46  ;;  %v1082_v33 = vadd.f32 %v1066_v45, %v1032_v2  ;;  %v1151_v17 = vmul.f32 0.6931472, %v1633_v30  ;;  %v1041_v60 = vmul.f32 %v2222_v12, %v1024_v27  ;;  %v867_v2 = vld [vmem:[#allocation4 + $0x78] sm:$0xff]  ;;  %vm2351_vm4 = vmmov %vm2324_vm0 }
 0x1d3   :  { %v1635_v5 = vpop.eup %1634  ;;  %v802_v15 = vpop.xlane.xlu1 %801  ;;  %v1057_v19 = vld [vmem:[#allocation5 + $0x40] sm:$0xff]  ;;  %v1139_v18 = vsub.f32 %v1399_v55, %v1024_v27  ;;  %v939_v55 = vld [vmem:[#allocation5 + $0x38] sm:$0xff] }
 0x1d4   :  { %842 = vst.msk [vmem:[#allocation3 + $0x30] sm:$0xff] %vm2337_vm1, %v825_v32  ;;  %v826_v34 = vadd.f32 %v802_v15, %v778_v21  ;;  %v1199_v50 = vmul.f32 0.6931472, %v1635_v5  ;;  %1642 = vlog2.f32 %v1082_v33  ;;  %v1178_v51 = vadd.f32 %v1130_v63, %v1082_v33  ;;  %v775_v21 = vld [vmem:[#allocation3 + $0x20] sm:$0xff]  ;;  %vm2352_vm1 = vmmov %vm2324_vm0 }
 0x1d5   :  { %v1637_v61 = vpop.eup %1636  ;;  %v816_v35 = vpop.xlane.xlu0 %815  ;;  %v1074_v24 = vmul.f32 %v2224_v13, %v1057_v19  ;;  %1644 = vlog2.f32 %v1189_v14  ;;  %v1050_v53 = vld [vmem:[#allocation5 + $0x8] sm:$0xff] }
 0x1d6   :  { %843 = vst.msk [vmem:[#allocation3 + $0x38] sm:$0xff] %vm2338_vm5, %v826_v34  ;;  %v833_v54 = vadd.f32 %v816_v35, %v785_v16  ;;  %v1228_v49 = vsub.f32 %v1151_v17, %v1199_v50  ;;  %1646 = vlog2.f32 %v1178_v51  ;;  %v1067_v3 = vmul.f32 %v2224_v13, %v1050_v53  ;;  %v783_v16 = vld [vmem:[#allocation3 + $0x60] sm:$0xff]  ;;  %v784_v51 = vld [vmem:[#allocation3 + $0x68] sm:$0xff]  ;;  %vm2353_vm5 = vmmov %vm2324_vm0 }
 0x1d7   :  { %v1639_v57 = vpop.eup %1638  ;;  %v818_v23 = vpop.xlane.xlu1 %817  ;;  %v1090_v58 = vadd.f32 %v1074_v24, %v1040_v48  ;;  %1648 = vlog2.f32 %v1093_v62  ;;  %v1099_v41 = vld [vmem:[#allocation3 + $0x8] sm:$0xff]  ;;  %v1167_v26 = vmul.f32 0.6931472, %v1637_v61 }
 0x1d8   :  { %850 = vst.msk [vmem:[#allocation3 + $0x70] sm:$0xff] %vm2339_vm6, %v833_v54  ;;  %v834_v59 = vadd.f32 %v818_v23, %v786_v52  ;;  %1254 = vperm.xlu1 %1583, %v1228_v49   ;;  %v1215_v37 = vmul.f32 0.6931472, %v1639_v57  ;;  %v1391_v47 = vadd.f32 -120.0, %v1099_v41  ;;  %v1083_v46 = vadd.f32 %v1067_v3, %v1033_v22  ;;  %vm2354_vm6 = vmmov %vm2324_vm0 }
 0x1d9   :  { %v881_v0 = vpop.xlane.xlu0 %880  ;;  %1650 = vlog2.f32 %v1090_v58  ;;  %v1186_v7 = vadd.f32 %v1138_v39, %v1090_v58  ;;  %v1058_v8 = vld [vmem:[#allocation5 + $0x48] sm:$0xff]  ;;  %v1641_v14 = vpop.eup %1640 }
 0x1da   :  { %851 = vst.msk [vmem:[#allocation3 + $0x78] sm:$0xff] %vm2324_vm0, %v834_v59  ;;  %v906_v44 = vadd.f32 %v881_v0, %v858_v38  ;;  %v1236_v62 = vsub.f32 %v1167_v26, %v1215_v37  ;;  %v1075_v1 = vmul.f32 %v2224_v13, %v1058_v8  ;;  %v1131_v56 = vsub.f32 %v1391_v47, %v1016_v28  ;;  %v856_v59 = vld [vmem:[#allocation4 + $0x20] sm:$0xff] }
 0x1db   :  { %v883_v36 = vpop.xlane.xlu1 %882  ;;  %1652 = vlog2.f32 %v1186_v7  ;;  %v1201_v26 = vmul.f32 0.6931472, %v1641_v14  ;;  %v857_v7 = vld [vmem:[#allocation4 + $0x28] sm:$0xff] }
 0x1dc   :  { %922 = vst.msk [vmem:[#allocation4 + $0x30] sm:$0xff] %vm2340_vm7, %v906_v44  ;;  %v907_v20 = vadd.f32 %v883_v36, %v859_v6  ;;  %1294 = vperm.xlu1 %1583, %v1236_v62   ;;  %v1091_v31 = vadd.f32 %v1075_v1, %v1041_v60  ;;  %1654 = vlog2.f32 %v2241_v40  ;;  %v1179_v45 = vadd.f32 %v1131_v56, %v1083_v46  ;;  %v864_v36 = vld [vmem:[#allocation4 + $0x60] sm:$0xff]  ;;  %vm2355_vm7 = vmmov %vm2324_vm0 }
 0x1dd   :  { %v897_v9 = vpop.xlane.xlu0 %896 }
 0x1de   :  { %923 = vst.msk [vmem:[#allocation4 + $0x38] sm:$0xff] %vm2341_vm8, %v907_v20  ;;  %v914_v10 = vadd.f32 %v897_v9, %v866_v4  ;;  %1656 = vlog2.f32 %v1091_v31  ;;  %v1187_v30 = vadd.f32 %v1139_v18, %v1091_v31  ;;  %v865_v18 = vld [vmem:[#allocation4 + $0x68] sm:$0xff]  ;;  %vm2356_vm8 = vmmov %vm2324_vm0 }
 0x1df   :  { %v899_v11 = vpop.xlane.xlu1 %898  ;;  %1658 = vlog2.f32 %v1179_v45  ;;  %v1104_v45 = vld [vmem:[#allocation3 + $0x30] sm:$0xff] }
 0x1e0   :  { %930 = vst.msk [vmem:[#allocation4 + $0x70] sm:$0xff] %vm2342_vm9, %v914_v10  ;;  %v915_v32 = vadd.f32 %v899_v11, %v867_v2  ;;  %1660 = vlog2.f32 %v1187_v30  ;;  %vm2357_vm9 = vmmov %vm2324_vm0 }
 0x1e1   :  { %v1643_v33 = vpop.eup %1642  ;;  %v796_v63 = vpop.xlane.xlu0 %795  ;;  %1662 = vlog2.f32 %v1083_v46 }
 0x1e2   :  { %v1645_v43 = vpop.eup %1644  ;;  %931 = vst.msk [vmem:[#allocation4 + $0x78] sm:$0xff] %vm2343_vm10, %v915_v32  ;;  %v823_v40 = vadd.f32 %v796_v63, %v775_v21  ;;  %v1147_v29 = vmul.f32 0.6931472, %v1643_v33  ;;  %v936_v21 = vld [vmem:[#allocation5 + $0x20] sm:$0xff]  ;;  %vm2358_vm10 = vmmov %vm2324_vm0 }
 0x1e3   :  { %v1647_v5 = vpop.eup %1646  ;;  %v798_v15 = vpop.xlane.xlu1 %797  ;;  %v1217_v48 = vmul.f32 0.6931472, %v1645_v43  ;;  %v1021_v2 = vld [vmem:[#allocation4 + $0x30] sm:$0xff] }
 0x1e4   :  { %v1649_v17 = vpop.eup %1648  ;;  %840 = vst.msk [vmem:[#allocation3 + $0x20] sm:$0xff] %vm2344_vm11, %v823_v40  ;;  %v824_v19 = vadd.f32 %v798_v15, %v776_v25  ;;  %v1195_v34 = vmul.f32 0.6931472, %v1647_v5  ;;  %v1038_v33 = vmul.f32 %v2222_v12, %v1021_v2  ;;  %v1396_v25 = vadd.f32 -120.0, %v1104_v45  ;;  %v937_v40 = vld [vmem:[#allocation5 + $0x28] sm:$0xff] }
 0x1e5   :  { %v812_v50 = vpop.xlane.xlu0 %811  ;;  %v1169_v49 = vmul.f32 0.6931472, %v1649_v17 }
 0x1e6   :  { %v1651_v61 = vpop.eup %1650  ;;  %841 = vst.msk [vmem:[#allocation3 + $0x28] sm:$0xff] %vm2345_vm13, %v824_v19  ;;  %v831_v35 = vadd.f32 %v812_v50, %v783_v16  ;;  %v1226_v52 = vsub.f32 %v1147_v29, %v1195_v34  ;;  %v1136_v16 = vsub.f32 %v1396_v25, %v1021_v2  ;;  %v944_v19 = vld [vmem:[#allocation5 + $0x60] sm:$0xff] }
 0x1e7   :  { %v814_v24 = vpop.xlane.xlu1 %813  ;;  %v1163_v28 = vmul.f32 0.6931472, %v1651_v61  ;;  %v1237_v58 = vsub.f32 %v1169_v49, %v1217_v48  ;;  %v946_v48 = vld [vmem:[#allocation5 + $0x70] sm:$0xff]  ;;  %v947_v49 = vld [vmem:[#allocation5 + $0x78] sm:$0xff] }
 0x1e8   :  { %v1653_v53 = vpop.eup %1652  ;;  %848 = vst.msk [vmem:[#allocation3 + $0x60] sm:$0xff] %vm2346_vm14, %v831_v35  ;;  %v832_v54 = vadd.f32 %v814_v24, %v784_v51  ;;  %1244 = vperm.xlu0 %1582, %v1226_v52   ;;  %v945_v51 = vld [vmem:[#allocation5 + $0x68] sm:$0xff] }
 0x1e9   :  { %v961_v27 = vpop.xlane.xlu0 %960  ;;  %v1211_v57 = vmul.f32 0.6931472, %v1653_v53  ;;  %v1655_v23 = vpop.eup %1654  ;;  %v1105_v53 = vld [vmem:[#allocation3 + $0x38] sm:$0xff] }
 0x1ea   :  { %849 = vst.msk [vmem:[#allocation3 + $0x68] sm:$0xff] %vm2347_vm15, %v832_v54  ;;  %v986_v38 = vadd.f32 %v961_v27, %v938_v42  ;;  %v1153_v60 = vmul.f32 0.6931472, %v1655_v23  ;;  %v1022_v42 = vld [vmem:[#allocation4 + $0x38] sm:$0xff] }
 0x1eb   :  { %v1657_v39 = vpop.eup %1656  ;;  %v963_v3 = vpop.xlane.xlu1 %962  ;;  %v1234_v41 = vsub.f32 %v1163_v28, %v1211_v57  ;;  %v1113_v23 = vld [vmem:[#allocation3 + $0x78] sm:$0xff] }
 0x1ec   :  { %v1659_v37 = vpop.eup %1658  ;;  %1002 = vst.msk [vmem:[#allocation5 + $0x30] sm:$0xff] %vm2348_vm12, %v986_v38  ;;  %v987_v47 = vadd.f32 %v963_v3, %v939_v55  ;;  %1299 = vperm.xlu0 %1582, %v1237_v58   ;;  %v1165_v44 = vmul.f32 0.6931472, %v1657_v39  ;;  %v1229_v56 = vsub.f32 %v1153_v60, %v1201_v26  ;;  %v1102_v55 = vld [vmem:[#allocation3 + $0x20] sm:$0xff]  ;;  %v1112_v38 = vld [vmem:[#allocation3 + $0x70] sm:$0xff]  ;;  %v1039_v3 = vmul.f32 %v2222_v12, %v1022_v42 }
 0x1ed   :  { %v1661_v0 = vpop.eup %1660  ;;  %1284 = vperm.xlu1 %1583, %v1234_v41   ;;  %v877_v6 = vpop.xlane.xlu0 %876  ;;  %v1197_v4 = vmul.f32 0.6931472, %v1659_v37  ;;  %v1397_v41 = vadd.f32 -120.0, %v1105_v53  ;;  %v1103_v60 = vld [vmem:[#allocation3 + $0x28] sm:$0xff] }
 0x1ee   :  { %v1663_v8 = vpop.eup %1662  ;;  %1003 = vst.msk [vmem:[#allocation5 + $0x38] sm:$0xff] %vm2349_vm2, %v987_v47  ;;  %v904_v22 = vadd.f32 %v877_v6, %v856_v59  ;;  %v1213_v62 = vmul.f32 0.6931472, %v1661_v0  ;;  %v2283_v59 = vld [vmem:[#allocation4 + $0x70] sm:$0xff]  ;;  %v1394_v0 = vadd.f32 -120.0, %v1102_v55  ;;  %v1395_v45 = vadd.f32 -120.0, %v1103_v60 }
 0x1ef   :  { %v879_v1 = vpop.xlane.xlu1 %878  ;;  %v1149_v9 = vmul.f32 0.6931472, %v1663_v8  ;;  %v1110_v6 = vld [vmem:[#allocation3 + $0x60] sm:$0xff] }
 0x1f0   :  { %920 = vst.msk [vmem:[#allocation4 + $0x20] sm:$0xff] %vm2350_vm3, %v904_v22  ;;  %v905_v46 = vadd.f32 %v879_v1, %v857_v7  ;;  %v1235_v20 = vsub.f32 %v1165_v44, %v1213_v62  ;;  %v1405_v44 = vadd.f32 -120.0, %v1113_v23  ;;  %v1404_v1 = vadd.f32 -120.0, %v1112_v38 }
 0x1f1   :  { %1259 = vperm.xlu1 %1583, %v1229_v56   ;;  %v893_v31 = vpop.xlane.xlu0 %892  ;;  %v1227_v11 = vsub.f32 %v1149_v9, %v1197_v4  ;;  %v1111_v4 = vld [vmem:[#allocation3 + $0x68] sm:$0xff] }
 0x1f2   :  { %921 = vst.msk [vmem:[#allocation4 + $0x28] sm:$0xff] %vm2351_vm4, %v905_v46  ;;  %v912_v10 = vadd.f32 %v893_v31, %v864_v36  ;;  %1289 = vperm.xlu0 %1582, %v1235_v20   ;;  %v1137_v46 = vsub.f32 %v1397_v41, %v1022_v42 }
 0x1f3   :  { %v895_v30 = vpop.xlane.xlu1 %894  ;;  %v1055_v14 = vld [vmem:[#allocation5 + $0x30] sm:$0xff] }
 0x1f4   :  { %928 = vst.msk [vmem:[#allocation4 + $0x60] sm:$0xff] %vm2352_vm1, %v912_v10  ;;  %v913_v32 = vadd.f32 %v895_v30, %v865_v18  ;;  %v1072_v63 = vmul.f32 %v2224_v13, %v1055_v14  ;;  %v1402_v18 = vadd.f32 -120.0, %v1110_v6  ;;  %v1046_v10 = vmul.f32 %v2222_v12, %v2283_v59 }
 0x1f5   :  { %1249 = vperm.xlu1 %1583, %v1227_v11   ;;  %v957_v43 = vpop.xlane.xlu0 %956  ;;  %v1056_v35 = vld [vmem:[#allocation5 + $0x38] sm:$0xff] }
 0x1f6   :  { %929 = vst.msk [vmem:[#allocation4 + $0x68] sm:$0xff] %vm2353_vm5, %v913_v32  ;;  %v984_v5 = vadd.f32 %v957_v43, %v936_v21  ;;  %v1088_v15 = vadd.f32 %v1072_v63, %v1038_v33  ;;  %v1073_v28 = vmul.f32 %v2224_v13, %v1056_v35  ;;  %v1403_v63 = vadd.f32 -120.0, %v1111_v4 }
 0x1f7   :  { %v959_v17 = vpop.xlane.xlu1 %958  ;;  %v1019_v27 = vld [vmem:[#allocation4 + $0x20] sm:$0xff] }
 0x1f8   :  { %1000 = vst.msk [vmem:[#allocation5 + $0x20] sm:$0xff] %vm2354_vm6, %v984_v5  ;;  %v985_v29 = vadd.f32 %v959_v17, %v937_v40  ;;  %1664 = vlog2.f32 %v1088_v15  ;;  %v1184_v34 = vadd.f32 %v1136_v16, %v1088_v15  ;;  %v1036_v37 = vmul.f32 %v2222_v12, %v1019_v27  ;;  %v1030_v16 = vld [vmem:[#allocation4 + $0x78] sm:$0xff] }
 0x1f9   :  { %v973_v50 = vpop.xlane.xlu0 %972  ;;  %v1020_v7 = vld [vmem:[#allocation4 + $0x28] sm:$0xff]  ;;  %v1089_v22 = vadd.f32 %v1073_v28, %v1039_v3  ;;  %v1134_v36 = vsub.f32 %v1394_v0, %v1019_v27  ;;  %v1145_v28 = vsub.f32 %v1405_v44, %v1030_v16 }
 0x1fa   :  { %1001 = vst.msk [vmem:[#allocation5 + $0x28] sm:$0xff] %vm2324_vm0, %v985_v29  ;;  %v992_v61 = vadd.f32 %v973_v50, %v944_v19  ;;  %1666 = vlog2.f32 %v1184_v34  ;;  %v1037_v2 = vmul.f32 %v2222_v12, %v1020_v7  ;;  %v1135_v34 = vsub.f32 %v1395_v45, %v1020_v7 }
 0x1fb   :  { %v975_v52 = vpop.xlane.xlu1 %974  ;;  %v1027_v8 = vld [vmem:[#allocation4 + $0x60] sm:$0xff]  ;;  %v1185_v25 = vadd.f32 %v1137_v46, %v1089_v22 }
 0x1fc   :  { %1008 = vst.msk [vmem:[#allocation5 + $0x60] sm:$0xff] %vm2355_vm7, %v992_v61  ;;  %v993_v24 = vadd.f32 %v975_v52, %v945_v51  ;;  %v1044_v11 = vmul.f32 %v2222_v12, %v1027_v8  ;;  %v1142_v32 = vsub.f32 %v1402_v18, %v1027_v8  ;;  %v1047_v52 = vmul.f32 %v2222_v12, %v1030_v16 }
 0x1fd   :  { %v977_v54 = vpop.xlane.xlu0 %976  ;;  %v1028_v9 = vld [vmem:[#allocation4 + $0x68] sm:$0xff] }
 0x1fe   :  { %1009 = vst.msk [vmem:[#allocation5 + $0x68] sm:$0xff] %vm2356_vm8, %v993_v24  ;;  %v994_v57 = vadd.f32 %v977_v54, %v946_v48  ;;  %v1045_v5 = vmul.f32 %v2222_v12, %v1028_v9  ;;  %v1143_v29 = vsub.f32 %v1403_v63, %v1028_v9 }
 0x1ff   :  { %v979_v58 = vpop.xlane.xlu1 %978  ;;  %v1053_v39 = vld [vmem:[#allocation5 + $0x20] sm:$0xff] }
 0x200   :  { %1010 = vst.msk [vmem:[#allocation5 + $0x70] sm:$0xff] %vm2357_vm9, %v994_v57  ;;  %v995_v26 = vadd.f32 %v979_v58, %v947_v49  ;;  %v1070_v47 = vmul.f32 %v2224_v13, %v1053_v39  ;;  %v1144_v57 = vsub.f32 %v1404_v1, %v2283_v59 }
 0x201   :  { %v1054_v62 = vld [vmem:[#allocation5 + $0x28] sm:$0xff] }
 0x202   :  { %1011 = vst.msk [vmem:[#allocation5 + $0x78] sm:$0xff] %vm2358_vm10, %v995_v26  ;;  %v1086_v56 = vadd.f32 %v1070_v47, %v1036_v37  ;;  %v1071_v20 = vmul.f32 %v2224_v13, %v1054_v62 }
 0x203   :  { %v1061_v31 = vld [vmem:[#allocation5 + $0x60] sm:$0xff] }
 0x204   :  { %1668 = vlog2.f32 %v1086_v56  ;;  %v1182_v30 = vadd.f32 %v1134_v36, %v1086_v56  ;;  %v1078_v21 = vmul.f32 %v2224_v13, %v1061_v31  ;;  %v1087_v43 = vadd.f32 %v1071_v20, %v1037_v2 }
 0x205   :  { %v1665_v14 = vpop.eup %1664  ;;  %v1062_v33 = vld [vmem:[#allocation5 + $0x68] sm:$0xff] }
 0x206   :  { %1670 = vlog2.f32 %v1182_v30  ;;  %v1094_v40 = vadd.f32 %v1078_v21, %v1044_v11  ;;  %v1079_v15 = vmul.f32 %v2224_v13, %v1062_v33  ;;  %v1159_v19 = vmul.f32 0.6931472, %v1665_v14 }
 0x207   :  { %v1667_v17 = vpop.eup %1666  ;;  %1672 = vlog2.f32 %v1089_v22  ;;  %v1063_v50 = vld [vmem:[#allocation5 + $0x70] sm:$0xff]  ;;  %v1183_v24 = vadd.f32 %v1135_v34, %v1087_v43 }
 0x208   :  { %v1207_v51 = vmul.f32 0.6931472, %v1667_v17  ;;  %1674 = vlog2.f32 %v1094_v40  ;;  %v1190_v61 = vadd.f32 %v1142_v32, %v1094_v40  ;;  %v1095_v35 = vadd.f32 %v1079_v15, %v1045_v5 }
 0x209   :  { %1676 = vlog2.f32 %v1185_v25  ;;  %v1064_v48 = vld [vmem:[#allocation5 + $0x78] sm:$0xff]  ;;  %v1080_v42 = vmul.f32 %v2224_v13, %v1063_v50 }
 0x20a   :  { %v1232_v53 = vsub.f32 %v1159_v19, %v1207_v51  ;;  %1678 = vlog2.f32 %v1190_v61  ;;  %v1191_v54 = vadd.f32 %v1143_v29, %v1095_v35  ;;  %v1081_v49 = vmul.f32 %v2224_v13, %v1064_v48 }
 0x20b   :  { %1680 = vlog2.f32 %v1095_v35  ;;  %v1096_v27 = vadd.f32 %v1080_v42, %v1046_v10 }
 0x20c   :  { %1274 = vperm.xlu1 %1583, %v1232_v53   ;;  %1682 = vlog2.f32 %v1191_v54  ;;  %v1097_v55 = vadd.f32 %v1081_v49, %v1047_v52 }
 0x20d   :  { %1684 = vlog2.f32 %v1183_v24  ;;  %v1192_v23 = vadd.f32 %v1144_v57, %v1096_v27 }
 0x20e   :  { %1686 = vlog2.f32 %v1097_v55  ;;  %v1193_v12 = vadd.f32 %v1145_v28, %v1097_v55 }
 0x20f   :  { %1688 = vlog2.f32 %v1087_v43 }
 0x210   :  { %1690 = vlog2.f32 %v1193_v12 }
 0x211   :  { %v1669_v38 = vpop.eup %1668  ;;  %1692 = vlog2.f32 %v1192_v23 }
 0x212   :  { %v1155_v3 = vmul.f32 0.6931472, %v1669_v38  ;;  %1694 = vlog2.f32 %v1096_v27 }
 0x213   :  { %v1671_v58 = vpop.eup %1670 }
 0x214   :  { %v1673_v39 = vpop.eup %1672  ;;  %v1203_v13 = vmul.f32 0.6931472, %v1671_v58 }
 0x215   :  { %v1675_v41 = vpop.eup %1674  ;;  %v1161_v4 = vmul.f32 0.6931472, %v1673_v39 }
 0x216   :  { %v1677_v26 = vpop.eup %1676  ;;  %v1230_v37 = vsub.f32 %v1155_v3, %v1203_v13  ;;  %v1171_v59 = vmul.f32 0.6931472, %v1675_v41 }
 0x217   :  { %v1679_v47 = vpop.eup %1678  ;;  %v1209_v62 = vmul.f32 0.6931472, %v1677_v26 }
 0x218   :  { %v1681_v0 = vpop.eup %1680  ;;  %1264 = vperm.xlu1 %1583, %v1230_v37   ;;  %v1219_v6 = vmul.f32 0.6931472, %v1679_v47 }
 0x219   :  { %v1683_v7 = vpop.eup %1682  ;;  %v1173_v22 = vmul.f32 0.6931472, %v1681_v0  ;;  %v1233_v20 = vsub.f32 %v1161_v4, %v1209_v62 }
 0x21a   :  { %v1685_v60 = vpop.eup %1684  ;;  %v1238_v8 = vsub.f32 %v1171_v59, %v1219_v6  ;;  %v1221_v44 = vmul.f32 0.6931472, %v1683_v7 }
 0x21b   :  { %v1687_v1 = vpop.eup %1686  ;;  %v1205_v9 = vmul.f32 0.6931472, %v1685_v60 }
 0x21c   :  { %v1689_v56 = vpop.eup %1688  ;;  %1304 = vperm.xlu1 %1583, %v1238_v8   ;;  %v1239_v36 = vsub.f32 %v1173_v22, %v1221_v44  ;;  %v1177_v31 = vmul.f32 0.6931472, %v1687_v1 }
 0x21d   :  { %v1691_v46 = vpop.eup %1690  ;;  %v1157_v10 = vmul.f32 0.6931472, %v1689_v56 }
 0x21e   :  { %1309 = vperm.xlu0 %1582, %v1239_v36   ;;  %v1225_v18 = vmul.f32 0.6931472, %v1691_v46  ;;  %v1693_v2 = vpop.eup %1692 }
 0x21f   :  { %v1695_v30 = vpop.eup %1694  ;;  %v1231_v11 = vsub.f32 %v1157_v10, %v1205_v9  ;;  %v1223_v21 = vmul.f32 0.6931472, %v1693_v2 }
 0x220   :  { %1279 = vperm.xlu1 %1583, %v1233_v20   ;;  %v1241_v45 = vsub.f32 %v1177_v31, %v1225_v18  ;;  %v1175_v14 = vmul.f32 0.6931472, %v1695_v30 }
 0x222   :  { %1319 = vperm.xlu0 %1582, %v1241_v45   ;;  %v1240_v32 = vsub.f32 %v1175_v14, %v1223_v21 }
 0x224   :  { %1269 = vperm.xlu1 %1583, %v1231_v11  }
 0x228   :  { %1314 = vperm.xlu1 %1583, %v1240_v32  }
 0x253   :  { %v1255_v33 = vpop.permute.xlu1 %1254 }
 0x254   :  { %1324 = vst [vmem:[#allocation8 + $0x10] sm:$0xff] %v1255_v33 }
 0x257   :  { %v1295_v63 = vpop.permute.xlu1 %1294 }
 0x258   :  { %1332 = vst [vmem:[#allocation8 + $0x50] sm:$0xff] %v1295_v63 }
 0x263   :  { %v1245_v25 = vpop.permute.xlu0 %1244 }
 0x264   :  { %1322 = vst [vmem:[#allocation8] sm:$0xff] %v1245_v25 }
 0x267   :  { %v1300_v43 = vpop.permute.xlu0 %1299 }
 0x268   :  { %v1285_v40 = vpop.permute.xlu1 %1284  ;;  %1333 = vst [vmem:[#allocation8 + $0x58] sm:$0xff] %v1300_v43 }
 0x269   :  { %1330 = vst [vmem:[#allocation8 + $0x40] sm:$0xff] %v1285_v40 }
 0x26c   :  { %v1260_v5 = vpop.permute.xlu1 %1259 }
 0x26d   :  { %1325 = vst [vmem:[#allocation8 + $0x18] sm:$0xff] %v1260_v5  ;;  %v1290_v15 = vpop.permute.xlu0 %1289 }
 0x26e   :  { %1331 = vst [vmem:[#allocation8 + $0x48] sm:$0xff] %v1290_v15 }
 0x270   :  { %v1250_v16 = vpop.permute.xlu1 %1249 }
 0x271   :  { %1323 = vst [vmem:[#allocation8 + $0x8] sm:$0xff] %v1250_v16 }
 0x287   :  { %v1275_v17 = vpop.permute.xlu1 %1274 }
 0x288   :  { %1328 = vst [vmem:[#allocation8 + $0x30] sm:$0xff] %v1275_v17 }
 0x293   :  { %v1265_v19 = vpop.permute.xlu1 %1264 }
 0x294   :  { %1326 = vst [vmem:[#allocation8 + $0x20] sm:$0xff] %v1265_v19 }
 0x297   :  { %v1305_v29 = vpop.permute.xlu1 %1304 }
 0x298   :  { %1334 = vst [vmem:[#allocation8 + $0x60] sm:$0xff] %v1305_v29 }
 0x299   :  { %v1310_v34 = vpop.permute.xlu0 %1309 }
 0x29a   :  { %1335 = vst [vmem:[#allocation8 + $0x68] sm:$0xff] %v1310_v34 }
 0x29b   :  { %v1280_v50 = vpop.permute.xlu1 %1279 }
 0x29c   :  { %1329 = vst [vmem:[#allocation8 + $0x38] sm:$0xff] %v1280_v50 }
 0x29d   :  { %v1320_v51 = vpop.permute.xlu0 %1319 }
 0x29e   :  { %1337 = vst [vmem:[#allocation8 + $0x78] sm:$0xff] %v1320_v51 }
 0x29f   :  { %v1270_v61 = vpop.permute.xlu1 %1269 }
 0x2a0   :  { %1327 = vst [vmem:[#allocation8 + $0x28] sm:$0xff] %v1270_v61 }
 0x2a3   :  { %v1315_v35 = vpop.permute.xlu1 %1314 }
 0x2a4   :  { %1336 = vst [vmem:[#allocation8 + $0x70] sm:$0xff] %v1315_v35 }
 0x2a5   :  { %1715 = shalt.err (!%p1712_p4)
}
 0x2a6   :  { %s1733_s13 = smov 128   ;;  %s1734_s14 = smov 8  }
 0x2a7   :  { %1349 = dma.vmem_to_hbm [thread:$0]  %s1344_s11, 2048, %s2309_s5, [#allocation9], %s1733_s13, %s1733_s13, %s1734_s14  }
 0x2a8   :  { %1726 = dma.done.wait [#allocation9], 2048  }
 0x2a9   :  { %1727 = vsyncadd [#allocation9], 4294965248 }
 0x2aa   :  { %1353 = vsyncpa [#allocation9], 1 }

</bundles_post_ra>
